<compile_context>
chip_gen: v5e
topology: v5e:2x2
jax: 0.10.0
libtpu: 0.0.40
codegen_flags: <defaults>
</compile_context>

<pallas_src>
import functools
import math

import jax
import jax.numpy as jnp
from jax.experimental import pallas as pl
from jax.experimental.pallas import tpu as pltpu

NUM_TAGS = 256  # default of the original module; overridden small in main


def _round_up(n, m):
    return ((n + m - 1) // m) * m


# ---------------------------------------------------------------------------
# Fused kernel: Conv1d(k=3,p=1)+BN(eval)+ReLU -> masked mean pool (T-tiled,
# accumulated in VMEM scratch) -> ProjectionHead (+residual, LayerNorm) -> fc
# ---------------------------------------------------------------------------
def _fused_forward_kernel(x_ref, lh_ref, rh_ref, m_ref, wc_ref, shift_ref,
                          w1_ref, b1_ref, w2_ref, b2_ref, g_ref, beta_ref,
                          wf_ref, bf_ref, out_ref, acc_ref, *, inv_h):
    f32, bf16 = jnp.float32, jnp.bfloat16
    Bb, Tt, D = x_ref.shape
    t = pl.program_id(1)

    @pl.when(t == 0)
    def _():
        acc_ref[...] = jnp.zeros_like(acc_ref)

    # ---- Conv1d(k=3, pad=1) on this T tile: bf16 shift/concat, one fused
    #      (Bb*Tt, 3D) @ (3D, D) MXU matmul with f32 accumulation.
    x3 = x_ref[...]                                            # (Bb, Tt, D) bf16
    lh = lh_ref[...].reshape(Bb, 1, D)                         # left halo row
    rh = rh_ref[...].reshape(Bb, 1, D)                         # right halo row
    x_prev = jnp.concatenate([lh, x3[:, :Tt - 1, :]], axis=1)  # x[t-1]
    x_next = jnp.concatenate([x3[:, 1:, :], rh], axis=1)       # x[t+1]
    xcat = jnp.concatenate([x_prev, x3, x_next], axis=2)       # (Bb, Tt, 3D) bf16
    conv = jnp.dot(xcat.reshape(Bb * Tt, 3 * D), wc_ref[...],
                   preferred_element_type=f32)                 # (Bb*Tt, D) f32

    # Folded conv-bias + BatchNorm(eval) shift, then ReLU (BN scale already
    # folded into the conv weights).
    y = jnp.maximum(conv + shift_ref[...], 0.0)

    # ---- Masked mean pooling: mask is pre-normalized (mask / count) on the
    #      host, so pooling is just a running masked sum across T tiles.
    m = m_ref[...]                                             # (Bb, Tt, 1) f32
    acc_ref[...] += jnp.sum(y.reshape(Bb, Tt, D) * m, axis=1)  # (Bb, D)

    # ---- Head: only on the last T tile of this batch block.
    @pl.when(t == pl.num_programs(1) - 1)
    def _():
        pooled = acc_ref[...]                                  # (Bb, D) f32
        proj = jnp.dot(pooled.astype(bf16), w1_ref[...],
                       preferred_element_type=f32) + b1_ref[...]   # (Bb, Hp)
        # TODO(synk): PyTorch nn.GELU() default is the exact erf form; tanh
        # approximation used for guaranteed TPU EUP lowering (~1e-3 drift).
        c = 0.7978845608028654                                 # sqrt(2/pi)
        h = 0.5 * proj * (1.0 + jnp.tanh(c * (proj + 0.044715 * proj * proj * proj)))
        z = jnp.dot(h.astype(bf16), w2_ref[...],
                    preferred_element_type=f32) + b2_ref[...]  # (Bb, Hp)
        r = z + proj                    # Dropout(p=0.3) is identity in eval
        # LayerNorm over the TRUE hidden width (padded columns of r are zero).
        mu = jnp.sum(r, axis=-1, keepdims=True) * inv_h
        var = jnp.sum(r * r, axis=-1, keepdims=True) * inv_h - mu * mu
        ln = (r - mu) * jax.lax.rsqrt(var + 1e-5) * g_ref[...] + beta_ref[...]
        # Final fc, lane-dense padded output (sliced back outside the kernel).
        out_ref[...] = jnp.dot(ln.astype(bf16), wf_ref[...],
                               preferred_element_type=f32) + bf_ref[...]


# ---------------------------------------------------------------------------
# One-time parameter massaging (hoisted out of the per-call forward path)
# ---------------------------------------------------------------------------
def prepare_params(params):
    f32, bf16 = jnp.float32, jnp.bfloat16
    D = params["conv_w"].shape[1]
    H = params["w1"].shape[1]
    C = params["wf"].shape[1]
    Hp = _round_up(H, 128)   # lane-dense hidden width
    Cp = _round_up(C, 128)   # lane-dense classifier width

    # Fold eval-mode BatchNorm1d into the conv weight / shift:
    #   ((x*W + b) - rm) * g/sqrt(rv+eps) + beta  ==  x*(W*scale) + shift
    scale = params["bn_g"] / jnp.sqrt(params["bn_rv"] + 1e-5)            # (D,)
    w_taps = jnp.transpose(params["conv_w"], (2, 1, 0))                  # (k, in, out)
    w_cat = (w_taps * scale[None, None, :]).reshape(3 * D, D)            # (3D, D)
    shift = (params["conv_b"] - params["bn_rm"]) * scale + params["bn_b"]

    # Zero-pad the head to Hp lanes (padded rows/cols zero => math over true H
    # stays exact; LayerNorm stats use inv_h = 1/H in the kernel).
    w1 = jnp.zeros((D, Hp), f32).at[:, :H].set(params["w1"])
    b1 = jnp.zeros((1, Hp), f32).at[:, :H].set(params["b1"][None, :])
    w2 = jnp.zeros((Hp, Hp), f32).at[:H, :H].set(params["w2"])
    b2 = jnp.zeros((1, Hp), f32).at[:, :H].set(params["b2"][None, :])
    ln_g = jnp.zeros((1, Hp), f32).at[:, :H].set(params["ln_g"][None, :])
    ln_b = jnp.zeros((1, Hp), f32).at[:, :H].set(params["ln_b"][None, :])
    wf = jnp.zeros((Hp, Cp), f32).at[:H, :C].set(params["wf"])
    bf = jnp.zeros((1, Cp), f32).at[:, :C].set(params["bf"][None, :])

    return {
        "w_cat": w_cat.astype(bf16),
        "shift": shift.reshape(1, D).astype(f32),
        "w1": w1.astype(bf16), "b1": b1,
        "w2": w2.astype(bf16), "b2": b2,
        "ln_g": ln_g, "ln_b": ln_b,
        "wf": wf.astype(bf16), "bf": bf,
        "dims": (int(D), int(H), int(Hp), int(C), int(Cp)),
    }


def _weight_spec(shape, index_map):
    """Grid-invariant parameter block; single-buffered to save VMEM."""
    try:
        return pl.BlockSpec(shape, index_map, pipeline_mode=pl.Buffered(1))
    except (AttributeError, TypeError, ValueError):
        return pl.BlockSpec(shape, index_map)


# ---------------------------------------------------------------------------
# Wrapper
# ---------------------------------------------------------------------------
def trans_network12_forward(x, attention_mask, prepped, *, block_b=None,
                            block_t=None):
    """x: (B, T, D) float, attention_mask: (B, T). Returns (B, num_classes)."""
    f32, bf16 = jnp.float32, jnp.bfloat16
    B, T, D = x.shape
    D_p, H, Hp, C, Cp = prepped["dims"]
    assert D == D_p

    # ---- block / padding choices (sublane-aligned, >=2 batch blocks when
    #      B >= 16 so v7x can shard the parallel axis across both TCs).
    if block_b is None:
        block_b = 8 if B <= 128 else 32
    block_b = max(8, _round_up(block_b, 8))
    Bp = _round_up(max(B, block_b), block_b)
    if block_t is None:
        block_t = min(_round_up(T, 8), 128)
    block_t = max(8, _round_up(block_t, 8))
    Tp = _round_up(max(T, block_t), block_t)
    n_b, n_t = Bp // block_b, Tp // block_t

    # ---- activation prep: bf16 input, zero padding (padded rows masked out),
    #      conv halo rows per T tile, host-normalized mask.
    xp = jnp.zeros((Bp, Tp, D), bf16).at[:B, :T, :].set(x.astype(bf16))

    zrow = jnp.zeros((Bp, 1, D), bf16)
    lh = jnp.concatenate([zrow, xp[:, block_t - 1:Tp - 1:block_t, :]], axis=1)
    rh = jnp.concatenate([xp[:, block_t:Tp:block_t, :], zrow], axis=1)
    lh = jnp.transpose(lh, (1, 0, 2))                 # (n_t, Bp, D)
    rh = jnp.transpose(rh, (1, 0, 2))                 # (n_t, Bp, D)

    m = attention_mask.astype(f32)
    cnt = jnp.maximum(jnp.sum(m, axis=1, keepdims=True), 1e-9)
    mp = jnp.zeros((Bp, Tp, 1), f32).at[:B, :T, 0].set(m / cnt)

    # ---- VMEM budget (double-buffered activation blocks + single-buffered
    #      weights + in-body transients), with headroom; keep under ~96 MiB.
    x_blk = block_b * block_t * D * 2
    halo_blk = 2 * block_b * D * 2
    msk_blk = block_b * block_t * 4
    out_blk = block_b * Cp * 4
    w_bytes = (3 * D * D + D * Hp + Hp * Hp + Hp * Cp) * 2 + (D + 6 * Hp + Cp) * 4
    acc_bytes = block_b * D * 4
    transients = (block_b * block_t * 3 * D) * 2 + 2 * block_b * block_t * D * 2 \
        + 2 * block_b * block_t * D * 4
    est = 2 * (x_blk + halo_blk + msk_blk + out_blk) + w_bytes + acc_bytes + transients
    vmem_limit = int(min(max(2 * est, 32 * 2**20), 96 * 2**20))

    cost = pl.CostEstimate(
        flops=int(2 * Bp * Tp * 3 * D * D
                  + 2 * Bp * (D * Hp + Hp * Hp + Hp * Cp)),
        transcendentals=int(Bp * Hp),
        bytes_accessed=int(Bp * Tp * D * 2 + Bp * Tp * 4
                           + (3 * D * D + D * Hp + Hp * Hp + Hp * Cp) * 2
                           + Bp * Cp * 4),
    )

    kernel = functools.partial(_fused_forward_kernel, inv_h=1.0 / float(H))
    const = lambda b, t: (0, 0)

    out_padded = pl.pallas_call(
        kernel,
        out_shape=jax.ShapeDtypeStruct((Bp, Cp), f32),
        grid=(n_b, n_t),
        in_specs=[
            pl.BlockSpec((block_b, block_t, D), lambda b, t: (b, t, 0)),
            pl.BlockSpec((1, block_b, D), lambda b, t: (t, b, 0)),
            pl.BlockSpec((1, block_b, D), lambda b, t: (t, b, 0)),
            pl.BlockSpec((block_b, block_t, 1), lambda b, t: (b, t, 0)),
            _weight_spec((3 * D, D), const),
            _weight_spec((1, D), const),
            _weight_spec((D, Hp), const),
            _weight_spec((1, Hp), const),
            _weight_spec((Hp, Hp), const),
            _weight_spec((1, Hp), const),
            _weight_spec((1, Hp), const),
            _weight_spec((1, Hp), const),
            _weight_spec((Hp, Cp), const),
            _weight_spec((1, Cp), const),
        ],
        out_specs=pl.BlockSpec((block_b, Cp), lambda b, t: (b, 0)),
        scratch_shapes=[pltpu.VMEM((block_b, D), jnp.float32)],
        compiler_params=pltpu.CompilerParams(
            dimension_semantics=("parallel", "arbitrary"),
            vmem_limit_bytes=vmem_limit),
        cost_estimate=cost,
    )(xp, lh, rh, mp,
      prepped["w_cat"], prepped["shift"],
      prepped["w1"], prepped["b1"], prepped["w2"], prepped["b2"],
      prepped["ln_g"], prepped["ln_b"], prepped["wf"], prepped["bf"])

    return out_padded[:B, :C]


# ---------------------------------------------------------------------------
# Pure-JAX reference (original un-folded math, for sanity checking)
# ---------------------------------------------------------------------------
def trans_network12_reference(x, attention_mask, params):
    B, T, D = x.shape
    w_taps = jnp.transpose(params["conv_w"], (2, 1, 0))
    xpad = jnp.pad(x, ((0, 0), (1, 1), (0, 0)))
    conv = sum(jnp.einsum("btd,de->bte", xpad[:, k:k + T, :], w_taps[k])
               for k in range(3)) + params["conv_b"]
    scale = params["bn_g"] / jnp.sqrt(params["bn_rv"] + 1e-5)
    y = jnp.maximum(conv * scale + (params["bn_b"] - params["bn_rm"] * scale), 0.0)
    m = attention_mask[..., None]
    pooled = jnp.sum(y * m, axis=1) / jnp.maximum(jnp.sum(m, axis=1), 1e-9)
    proj = pooled @ params["w1"] + params["b1"]
    c = math.sqrt(2.0 / math.pi)
    h = 0.5 * proj * (1.0 + jnp.tanh(c * (proj + 0.044715 * proj ** 3)))
    r = (h @ params["w2"] + params["b2"]) + proj
    mu = jnp.mean(r, axis=-1, keepdims=True)
    var = jnp.mean((r - mu) ** 2, axis=-1, keepdims=True)
    ln = (r - mu) / jnp.sqrt(var + 1e-5) * params["ln_g"] + params["ln_b"]
    return ln @ params["wf"] + params["bf"]


# ---------------------------------------------------------------------------
def make_params(key, D, H, C):
    ks = jax.random.split(key, 8)
    n = lambda k, s, sc=0.05: (jax.random.normal(k, s, jnp.float32) * sc)
    return {
        "conv_w": n(ks[0], (D, D, 3)),
        "conv_b": n(ks[1], (D,)),
        "bn_g": 1.0 + n(ks[2], (D,), 0.01),
        "bn_b": n(ks[2], (D,), 0.01),
        "bn_rm": n(ks[3], (D,), 0.01),
        "bn_rv": 1.0 + jnp.abs(n(ks[3], (D,), 0.01)),
        "w1": n(ks[4], (D, H)),
        "b1": n(ks[4], (H,)),
        "w2": n(ks[5], (H, H)),
        "b2": n(ks[5], (H,)),
        "ln_g": jnp.ones((H,), jnp.float32),
        "ln_b": jnp.zeros((H,), jnp.float32),
        "wf": n(ks[6], (H, C)),
        "bf": n(ks[7], (C,)),
    }


if __name__ == "__main__":
    # Small synthetic shapes; block_b=8 / block_t=8 give a (2, 2) grid so both
    # the parallel batch axis and the T reduction axis are exercised.
    B, T, D, H, C = 16, 16, 128, 64, 32
    key = jax.random.PRNGKey(0)
    kx, kp, kl = jax.random.split(key, 3)

    x = jax.random.normal(kx, (B, T, D), jnp.float32)
    lengths = jax.random.randint(kl, (B,), 3, T + 1)
    attention_mask = (jnp.arange(T)[None, :] < lengths[:, None]).astype(jnp.float32)
    params = make_params(kp, D, H, C)

    prepped = prepare_params(params)     # hoisted once, outside the call path
    fwd = jax.jit(functools.partial(trans_network12_forward, prepped=prepped,
                                    block_b=8, block_t=8))

    out = jax.block_until_ready(fwd(x, attention_mask))
    assert out.shape == (B, C)

    ref = trans_network12_reference(x, attention_mask, params)
    err = float(jnp.max(jnp.abs(out - ref)))
    assert jnp.allclose(out, ref, atol=5e-2, rtol=5e-2), f"max abs err {err}"

    print("KERNEL_OK")
</pallas_src>

<mosaic_0001>
module attributes {stable_mosaic.version = 11 : i64} {
  func.func @_fused_forward_kernel(%arg0: i32, %arg1: i32, %arg2: memref<8x8x128xbf16, #tpu.memory_space<vmem>>, %arg3: memref<1x8x128xbf16, #tpu.memory_space<vmem>>, %arg4: memref<1x8x128xbf16, #tpu.memory_space<vmem>>, %arg5: memref<8x8x1xf32, #tpu.memory_space<vmem>>, %arg6: memref<384x128xbf16, #tpu.memory_space<vmem>>, %arg7: memref<1x128xf32, #tpu.memory_space<vmem>>, %arg8: memref<128x128xbf16, #tpu.memory_space<vmem>>, %arg9: memref<1x128xf32, #tpu.memory_space<vmem>>, %arg10: memref<128x128xbf16, #tpu.memory_space<vmem>>, %arg11: memref<1x128xf32, #tpu.memory_space<vmem>>, %arg12: memref<1x128xf32, #tpu.memory_space<vmem>>, %arg13: memref<1x128xf32, #tpu.memory_space<vmem>>, %arg14: memref<128x128xbf16, #tpu.memory_space<vmem>>, %arg15: memref<1x128xf32, #tpu.memory_space<vmem>>, %arg16: memref<8x128xf32, #tpu.memory_space<vmem>>, %arg17: memref<8x128xf32, #tpu.memory_space<vmem>>) attributes {dimension_semantics = [#tpu.dimension_semantics<parallel>, #tpu.dimension_semantics<arbitrary>], iteration_bounds = array<i64: 2, 2>, scalar_prefetch = 0 : i64, scratch_operands = 1 : i64, tpu.core_type = #tpu.core_type<tc>, window_params = [{transform_indices = @transform_0, window_bounds = array<i64: 8, 8, 128>}, {transform_indices = @transform_1, window_bounds = array<i64: 1, 8, 128>}, {transform_indices = @transform_2, window_bounds = array<i64: 1, 8, 128>}, {transform_indices = @transform_3, window_bounds = array<i64: 8, 8, 1>}, {pipeline_mode = #tpu.pipeline_mode<synchronous>, transform_indices = @transform_4, window_bounds = array<i64: 384, 128>}, {pipeline_mode = #tpu.pipeline_mode<synchronous>, transform_indices = @transform_5, window_bounds = array<i64: 1, 128>}, {pipeline_mode = #tpu.pipeline_mode<synchronous>, transform_indices = @transform_6, window_bounds = array<i64: 128, 128>}, {pipeline_mode = #tpu.pipeline_mode<synchronous>, transform_indices = @transform_7, window_bounds = array<i64: 1, 128>}, {pipeline_mode = #tpu.pipeline_mode<synchronous>, transform_indices = @transform_8, window_bounds = array<i64: 128, 128>}, {pipeline_mode = #tpu.pipeline_mode<synchronous>, transform_indices = @transform_9, window_bounds = array<i64: 1, 128>}, {pipeline_mode = #tpu.pipeline_mode<synchronous>, transform_indices = @transform_10, window_bounds = array<i64: 1, 128>}, {pipeline_mode = #tpu.pipeline_mode<synchronous>, transform_indices = @transform_11, window_bounds = array<i64: 1, 128>}, {pipeline_mode = #tpu.pipeline_mode<synchronous>, transform_indices = @transform_12, window_bounds = array<i64: 128, 128>}, {pipeline_mode = #tpu.pipeline_mode<synchronous>, transform_indices = @transform_13, window_bounds = array<i64: 1, 128>}, {transform_indices = @transform_14, window_bounds = array<i64: 8, 128>}]} {
    %c0_i32 = arith.constant 0 : i32
    %0 = arith.cmpi eq, %arg1, %c0_i32 : i32
    %1 = arith.extui %0 : i1 to i32
    %c0_i32_0 = arith.constant 0 : i32
    %2 = arith.cmpi ne, %1, %c0_i32_0 : i32
    scf.if %2 {
      %cst_23 = arith.constant 0.000000e+00 : f32
      %32 = vector.broadcast %cst_23 : f32 to vector<8x128xf32>
      %c0_24 = arith.constant 0 : index
      %c0_25 = arith.constant 0 : index
      %33 = vector.load %arg17[%c0_24, %c0_25] : memref<8x128xf32, #tpu.memory_space<vmem>>, vector<8x128xf32>
      tpu.vector_store %arg17[%c0_24, %c0_25], %32 {strides = array<i32>} : memref<8x128xf32, #tpu.memory_space<vmem>>, vector<8x128xf32>,
    } else {
    }
    %c0 = arith.constant 0 : index
    %c0_1 = arith.constant 0 : index
    %c0_2 = arith.constant 0 : index
    %3 = vector.load %arg2[%c0, %c0_1, %c0_2] : memref<8x8x128xbf16, #tpu.memory_space<vmem>>, vector<8x8x128xbf16>
    %c0_3 = arith.constant 0 : index
    %c0_4 = arith.constant 0 : index
    %c0_5 = arith.constant 0 : index
    %4 = vector.load %arg3[%c0_3, %c0_4, %c0_5] : memref<1x8x128xbf16, #tpu.memory_space<vmem>>, vector<1x8x128xbf16>
    %5 = vector.shape_cast %4 : vector<1x8x128xbf16> to vector<8x1x128xbf16>
    %c0_6 = arith.constant 0 : index
    %c0_7 = arith.constant 0 : index
    %c0_8 = arith.constant 0 : index
    %6 = vector.load %arg4[%c0_6, %c0_7, %c0_8] : memref<1x8x128xbf16, #tpu.memory_space<vmem>>, vector<1x8x128xbf16>
    %7 = vector.shape_cast %6 : vector<1x8x128xbf16> to vector<8x1x128xbf16>
    %8 = vector.extract_strided_slice %3 {offsets = [0, 0, 0], sizes = [8, 7, 128], strides = [1, 1, 1]} : vector<8x8x128xbf16> to vector<8x7x128xbf16>
    %9 = tpu.concatenate %5, %8 in 1 : vector<8x1x128xbf16>, vector<8x7x128xbf16> -> vector<8x8x128xbf16>
    %10 = vector.extract_strided_slice %3 {offsets = [0, 1, 0], sizes = [8, 7, 128], strides = [1, 1, 1]} : vector<8x8x128xbf16> to vector<8x7x128xbf16>
    %11 = tpu.concatenate %10, %7 in 1 : vector<8x7x128xbf16>, vector<8x1x128xbf16> -> vector<8x8x128xbf16>
    %12 = tpu.concatenate %9, %3, %11 in 2 : vector<8x8x128xbf16>, vector<8x8x128xbf16>, vector<8x8x128xbf16> -> vector<8x8x384xbf16>
    %13 = vector.shape_cast %12 : vector<8x8x384xbf16> to vector<64x384xbf16>
    %c0_9 = arith.constant 0 : index
    %c0_10 = arith.constant 0 : index
    %14 = vector.load %arg6[%c0_9, %c0_10] : memref<384x128xbf16, #tpu.memory_space<vmem>>, vector<384x128xbf16>
    %cst = arith.constant dense<0.000000e+00> : vector<64x128xf32>
    %15 = tpu.matmul %13, %14, %cst {dimension_numbers = #tpu.dot_dimension_numbers<[1], [0], [0], [1], [0, 0, 1, 1], [], []>} : vector<64x384xbf16>, vector<384x128xbf16>, vector<64x128xf32> -> vector<64x128xf32>
    %c0_11 = arith.constant 0 : index
    %c0_12 = arith.constant 0 : index
    %16 = vector.load %arg7[%c0_11, %c0_12] : memref<1x128xf32, #tpu.memory_space<vmem>>, vector<1x128xf32>
    %17 = vector.broadcast %16 : vector<1x128xf32> to vector<64x128xf32>
    %18 = arith.addf %15, %17 : vector<64x128xf32>
    %cst_13 = arith.constant 0.000000e+00 : f32
    %19 = vector.broadcast %cst_13 : f32 to vector<64x128xf32>
    %20 = arith.maximumf %18, %19 : vector<64x128xf32>
    %c0_14 = arith.constant 0 : index
    %c0_15 = arith.constant 0 : index
    %c0_16 = arith.constant 0 : index
    %21 = vector.load %arg5[%c0_14, %c0_15, %c0_16] : memref<8x8x1xf32, #tpu.memory_space<vmem>>, vector<8x8x1xf32>
    %c0_17 = arith.constant 0 : index
    %c0_18 = arith.constant 0 : index
    %22 = vector.load %arg17[%c0_17, %c0_18] : memref<8x128xf32, #tpu.memory_space<vmem>>, vector<8x128xf32>
    %23 = vector.shape_cast %20 : vector<64x128xf32> to vector<8x8x128xf32>
    %24 = vector.broadcast %21 : vector<8x8x1xf32> to vector<8x8x128xf32>
    %25 = arith.mulf %23, %24 : vector<8x8x128xf32>
    %cst_19 = arith.constant dense<0.000000e+00> : vector<8x128xf32>
    %26 = vector.multi_reduction <add>, %25, %cst_19 [1] : vector<8x8x128xf32> to vector<8x128xf32>
    %27 = arith.addf %22, %26 : vector<8x128xf32>
    %c0_20 = arith.constant 0 : index
    %c0_21 = arith.constant 0 : index
    %28 = vector.load %arg17[%c0_20, %c0_21] : memref<8x128xf32, #tpu.memory_space<vmem>>, vector<8x128xf32>
    tpu.vector_store %arg17[%c0_20, %c0_21], %27 {strides = array<i32>} : memref<8x128xf32, #tpu.memory_space<vmem>>, vector<8x128xf32>,
    %c1_i32 = arith.constant 1 : i32
    %29 = arith.cmpi eq, %arg1, %c1_i32 : i32
    %30 = arith.extui %29 : i1 to i32
    %c0_i32_22 = arith.constant 0 : i32
    %31 = arith.cmpi ne, %30, %c0_i32_22 : i32
    scf.if %31 {
      %c0_23 = arith.constant 0 : index
      %c0_24 = arith.constant 0 : index
      %32 = vector.load %arg17[%c0_23, %c0_24] : memref<8x128xf32, #tpu.memory_space<vmem>>, vector<8x128xf32>
      %33 = arith.truncf %32 : vector<8x128xf32> to vector<8x128xbf16>
      %c0_25 = arith.constant 0 : index
      %c0_26 = arith.constant 0 : index
      %34 = vector.load %arg8[%c0_25, %c0_26] : memref<128x128xbf16, #tpu.memory_space<vmem>>, vector<128x128xbf16>
      %cst_27 = arith.constant dense<0.000000e+00> : vector<8x128xf32>
      %35 = tpu.matmul %33, %34, %cst_27 {dimension_numbers = #tpu.dot_dimension_numbers<[1], [0], [0], [1], [0, 0, 1, 1], [], []>} : vector<8x128xbf16>, vector<128x128xbf16>, vector<8x128xf32> -> vector<8x128xf32>
      %c0_28 = arith.constant 0 : index
      %c0_29 = arith.constant 0 : index
      %36 = vector.load %arg9[%c0_28, %c0_29] : memref<1x128xf32, #tpu.memory_space<vmem>>, vector<1x128xf32>
      %37 = vector.broadcast %36 : vector<1x128xf32> to vector<8x128xf32>
      %38 = arith.addf %35, %37 : vector<8x128xf32>
      %cst_30 = arith.constant 5.000000e-01 : f32
      %39 = vector.broadcast %cst_30 : f32 to vector<8x128xf32>
      %40 = arith.mulf %39, %38 : vector<8x128xf32>
      %cst_31 = arith.constant 4.471500e-02 : f32
      %41 = vector.broadcast %cst_31 : f32 to vector<8x128xf32>
      %42 = arith.mulf %41, %38 : vector<8x128xf32>
      %43 = arith.mulf %42, %38 : vector<8x128xf32>
      %44 = arith.mulf %43, %38 : vector<8x128xf32>
      %45 = arith.addf %38, %44 : vector<8x128xf32>
      %cst_32 = arith.constant 0.797884583 : f32
      %46 = vector.broadcast %cst_32 : f32 to vector<8x128xf32>
      %47 = arith.mulf %46, %45 : vector<8x128xf32>
      %48 = math.tanh %47 : vector<8x128xf32>
      %cst_33 = arith.constant 1.000000e+00 : f32
      %49 = vector.broadcast %cst_33 : f32 to vector<8x128xf32>
      %50 = arith.addf %49, %48 : vector<8x128xf32>
      %51 = arith.mulf %40, %50 : vector<8x128xf32>
      %52 = arith.truncf %51 : vector<8x128xf32> to vector<8x128xbf16>
      %c0_34 = arith.constant 0 : index
      %c0_35 = arith.constant 0 : index
      %53 = vector.load %arg10[%c0_34, %c0_35] : memref<128x128xbf16, #tpu.memory_space<vmem>>, vector<128x128xbf16>
      %cst_36 = arith.constant dense<0.000000e+00> : vector<8x128xf32>
      %54 = tpu.matmul %52, %53, %cst_36 {dimension_numbers = #tpu.dot_dimension_numbers<[1], [0], [0], [1], [0, 0, 1, 1], [], []>} : vector<8x128xbf16>, vector<128x128xbf16>, vector<8x128xf32> -> vector<8x128xf32>
      %c0_37 = arith.constant 0 : index
      %c0_38 = arith.constant 0 : index
      %55 = vector.load %arg11[%c0_37, %c0_38] : memref<1x128xf32, #tpu.memory_space<vmem>>, vector<1x128xf32>
      %56 = vector.broadcast %55 : vector<1x128xf32> to vector<8x128xf32>
      %57 = arith.addf %54, %56 : vector<8x128xf32>
      %58 = arith.addf %57, %38 : vector<8x128xf32>
      %cst_39 = arith.constant dense<0.000000e+00> : vector<8xf32>
      %59 = vector.multi_reduction <add>, %58, %cst_39 [1] : vector<8x128xf32> to vector<8xf32>
      %60 = vector.shape_cast %59 : vector<8xf32> to vector<8x1xf32>
      %cst_40 = arith.constant 1.562500e-02 : f32
      %61 = vector.broadcast %cst_40 : f32 to vector<8x1xf32>
      %62 = arith.mulf %60, %61 : vector<8x1xf32>
      %63 = arith.mulf %58, %58 : vector<8x128xf32>
      %cst_41 = arith.constant dense<0.000000e+00> : vector<8xf32>
      %64 = vector.multi_reduction <add>, %63, %cst_41 [1] : vector<8x128xf32> to vector<8xf32>
      %65 = vector.shape_cast %64 : vector<8xf32> to vector<8x1xf32>
      %cst_42 = arith.constant 1.562500e-02 : f32
      %66 = vector.broadcast %cst_42 : f32 to vector<8x1xf32>
      %67 = arith.mulf %65, %66 : vector<8x1xf32>
      %68 = arith.mulf %62, %62 : vector<8x1xf32>
      %69 = arith.subf %67, %68 : vector<8x1xf32>
      %70 = vector.broadcast %62 : vector<8x1xf32> to vector<8x128xf32>
      %71 = arith.subf %58, %70 : vector<8x128xf32>
      %cst_43 = arith.constant 9.99999974E-6 : f32
      %72 = vector.broadcast %cst_43 : f32 to vector<8x1xf32>
      %73 = arith.addf %69, %72 : vector<8x1xf32>
      %74 = math.rsqrt %73 : vector<8x1xf32>
      %75 = vector.broadcast %74 : vector<8x1xf32> to vector<8x128xf32>
      %76 = arith.mulf %71, %75 : vector<8x128xf32>
      %c0_44 = arith.constant 0 : index
      %c0_45 = arith.constant 0 : index
      %77 = vector.load %arg12[%c0_44, %c0_45] : memref<1x128xf32, #tpu.memory_space<vmem>>, vector<1x128xf32>
      %78 = vector.broadcast %77 : vector<1x128xf32> to vector<8x128xf32>
      %79 = arith.mulf %76, %78 : vector<8x128xf32>
      %c0_46 = arith.constant 0 : index
      %c0_47 = arith.constant 0 : index
      %80 = vector.load %arg13[%c0_46, %c0_47] : memref<1x128xf32, #tpu.memory_space<vmem>>, vector<1x128xf32>
      %81 = vector.broadcast %80 : vector<1x128xf32> to vector<8x128xf32>
      %82 = arith.addf %79, %81 : vector<8x128xf32>
      %83 = arith.truncf %82 : vector<8x128xf32> to vector<8x128xbf16>
      %c0_48 = arith.constant 0 : index
      %c0_49 = arith.constant 0 : index
      %84 = vector.load %arg14[%c0_48, %c0_49] : memref<128x128xbf16, #tpu.memory_space<vmem>>, vector<128x128xbf16>
      %cst_50 = arith.constant dense<0.000000e+00> : vector<8x128xf32>
      %85 = tpu.matmul %83, %84, %cst_50 {dimension_numbers = #tpu.dot_dimension_numbers<[1], [0], [0], [1], [0, 0, 1, 1], [], []>} : vector<8x128xbf16>, vector<128x128xbf16>, vector<8x128xf32> -> vector<8x128xf32>
      %c0_51 = arith.constant 0 : index
      %c0_52 = arith.constant 0 : index
      %86 = vector.load %arg15[%c0_51, %c0_52] : memref<1x128xf32, #tpu.memory_space<vmem>>, vector<1x128xf32>
      %87 = vector.broadcast %86 : vector<1x128xf32> to vector<8x128xf32>
      %88 = arith.addf %85, %87 : vector<8x128xf32>
      %c0_53 = arith.constant 0 : index
      %c0_54 = arith.constant 0 : index
      %89 = vector.load %arg16[%c0_53, %c0_54] : memref<8x128xf32, #tpu.memory_space<vmem>>, vector<8x128xf32>
      tpu.vector_store %arg16[%c0_53, %c0_54], %88 {strides = array<i32>} : memref<8x128xf32, #tpu.memory_space<vmem>>, vector<8x128xf32>,
    } else {
    }
    return
  }
  func.func @transform_0(%arg0: i32, %arg1: i32) -> (i32, i32, i32) {
    %c0_i32 = arith.constant 0 : i32
    %c0_i32_0 = arith.constant 0 : i32
    return %arg0, %arg1, %c0_i32 : i32, i32, i32
  }
  func.func @transform_1(%arg0: i32, %arg1: i32) -> (i32, i32, i32) {
    %c0_i32 = arith.constant 0 : i32
    %c0_i32_0 = arith.constant 0 : i32
    return %arg1, %arg0, %c0_i32 : i32, i32, i32
  }
  func.func @transform_2(%arg0: i32, %arg1: i32) -> (i32, i32, i32) {
    %c0_i32 = arith.constant 0 : i32
    %c0_i32_0 = arith.constant 0 : i32
    return %arg1, %arg0, %c0_i32 : i32, i32, i32
  }
  func.func @transform_3(%arg0: i32, %arg1: i32) -> (i32, i32, i32) {
    %c0_i32 = arith.constant 0 : i32
    %c0_i32_0 = arith.constant 0 : i32
    return %arg0, %arg1, %c0_i32 : i32, i32, i32
  }
  func.func @transform_4(%arg0: i32, %arg1: i32) -> (i32, i32) {
    %c0_i32 = arith.constant 0 : i32
    %c0_i32_0 = arith.constant 0 : i32
    %c0_i32_1 = arith.constant 0 : i32
    return %c0_i32, %c0_i32_0 : i32, i32
  }
  func.func @transform_5(%arg0: i32, %arg1: i32) -> (i32, i32) {
    %c0_i32 = arith.constant 0 : i32
    %c0_i32_0 = arith.constant 0 : i32
    %c0_i32_1 = arith.constant 0 : i32
    return %c0_i32, %c0_i32_0 : i32, i32
  }
  func.func @transform_6(%arg0: i32, %arg1: i32) -> (i32, i32) {
    %c0_i32 = arith.constant 0 : i32
    %c0_i32_0 = arith.constant 0 : i32
    %c0_i32_1 = arith.constant 0 : i32
    return %c0_i32, %c0_i32_0 : i32, i32
  }
  func.func @transform_7(%arg0: i32, %arg1: i32) -> (i32, i32) {
    %c0_i32 = arith.constant 0 : i32
    %c0_i32_0 = arith.constant 0 : i32
    %c0_i32_1 = arith.constant 0 : i32
    return %c0_i32, %c0_i32_0 : i32, i32
  }
  func.func @transform_8(%arg0: i32, %arg1: i32) -> (i32, i32) {
    %c0_i32 = arith.constant 0 : i32
    %c0_i32_0 = arith.constant 0 : i32
    %c0_i32_1 = arith.constant 0 : i32
    return %c0_i32, %c0_i32_0 : i32, i32
  }
  func.func @transform_9(%arg0: i32, %arg1: i32) -> (i32, i32) {
    %c0_i32 = arith.constant 0 : i32
    %c0_i32_0 = arith.constant 0 : i32
    %c0_i32_1 = arith.constant 0 : i32
    return %c0_i32, %c0_i32_0 : i32, i32
  }
  func.func @transform_10(%arg0: i32, %arg1: i32) -> (i32, i32) {
    %c0_i32 = arith.constant 0 : i32
    %c0_i32_0 = arith.constant 0 : i32
    %c0_i32_1 = arith.constant 0 : i32
    return %c0_i32, %c0_i32_0 : i32, i32
  }
  func.func @transform_11(%arg0: i32, %arg1: i32) -> (i32, i32) {
    %c0_i32 = arith.constant 0 : i32
    %c0_i32_0 = arith.constant 0 : i32
    %c0_i32_1 = arith.constant 0 : i32
    return %c0_i32, %c0_i32_0 : i32, i32
  }
  func.func @transform_12(%arg0: i32, %arg1: i32) -> (i32, i32) {
    %c0_i32 = arith.constant 0 : i32
    %c0_i32_0 = arith.constant 0 : i32
    %c0_i32_1 = arith.constant 0 : i32
    return %c0_i32, %c0_i32_0 : i32, i32
  }
  func.func @transform_13(%arg0: i32, %arg1: i32) -> (i32, i32) {
    %c0_i32 = arith.constant 0 : i32
    %c0_i32_0 = arith.constant 0 : i32
    %c0_i32_1 = arith.constant 0 : i32
    return %c0_i32, %c0_i32_0 : i32, i32
  }
  func.func @transform_14(%arg0: i32, %arg1: i32) -> (i32, i32) {
    %c0_i32 = arith.constant 0 : i32
    %c0_i32_0 = arith.constant 0 : i32
    return %arg0, %c0_i32 : i32, i32
  }
}

</mosaic_0001>

<bundles_post_ra>
// kernel: trans_network12_forward.1
= control target key start
LH: loop header
LB: loop body
LE: loop exit
PB: predicated region body
PF: predicated region fallthrough
CT: control target
= control target key end

     0   :  { %s2967_s0 = inlined_call_operand.vmem [shape: bf16[16,16,128], index: 0, kind: input, shape index: {}]   ;;  %s2968_s1 = inlined_call_operand.vmem [shape: bf16[2,16,128], index: 1, kind: input, shape index: {}]   ;;  %s2969_s2 = inlined_call_operand.vmem [shape: bf16[2,16,128], index: 2, kind: input, shape index: {}]   ;;  %s2970_s3 = inlined_call_operand.vmem [shape: f32[16,16,1], index: 3, kind: input, shape index: {}]   ;;  %s2971_s4 = inlined_call_operand.vmem [shape: bf16[384,128], index: 4, kind: input, shape index: {}]   ;;  %s2972_s5 = inlined_call_operand.vmem [shape: f32[1,128], index: 5, kind: input, shape index: {}]   ;;  %s2973_s6 = inlined_call_operand.vmem [shape: bf16[128,128], index: 6, kind: input, shape index: {}]   ;;  %s2974_s7 = inlined_call_operand.vmem [shape: f32[1,128], index: 7, kind: input, shape index: {}]   ;;  %s2975_s8 = inlined_call_operand.vmem [shape: bf16[128,128], index: 8, kind: input, shape index: {}]   ;;  %s2976_s9 = inlined_call_operand.vmem [shape: f32[1,128], index: 9, kind: input, shape index: {}]   ;;  %s2977_s10 = inlined_call_operand.vmem [shape: f32[1,128], index: 10, kind: input, shape index: {}]   ;;  %s2978_s11 = inlined_call_operand.vmem [shape: f32[1,128], index: 11, kind: input, shape index: {}]   ;;  %s2979_s12 = inlined_call_operand.vmem [shape: bf16[128,128], index: 12, kind: input, shape index: {}]   ;;  %s2980_s13 = inlined_call_operand.vmem [shape: f32[1,128], index: 13, kind: input, shape index: {}]   ;;  %s2981_s14 = inlined_call_operand.hbm [shape: f32[16,128], index: 14, kind: output, shape index: {}]  }
   0x1   :  { %2992 = sst [smem:[#allocation16_spill]] %s2967_s0 }
   0x2   :  { %2993 = sst [smem:[#allocation17_spill]] %s2970_s3 }
   0x3   :  { %2994 = sst [smem:[#allocation18_spill]] %s2976_s9 }
   0x4   :  { %2995 = sst [smem:[#allocation19_spill]] %s2977_s10 }
   0x5   :  { %2996 = sst [smem:[#allocation20_spill]] %s2978_s11 }
   0x6   :  { %2997 = sst [smem:[#allocation21_spill]] %s2979_s12 }
   0x7   :  { %2998 = sst [smem:[#allocation22_spill]] %s2980_s13 }
   0x8   :  { %2999 = sst [smem:[#allocation23_spill]] %s2981_s14 }
   0x9   :  { %19 = vsyncpa [#allocation6], 0 }
   0xa   :  { %21 = vsyncpa [#allocation6 + $0x1], 0  ;;  %s2465_s29 = smov 0   ;;  %s2467_s30 = smov 0  }
   0xb   :  { %s2469_s15 = smov 0   ;;  %s2471_s16 = smov 0  }
   0xc   :  { %s2473_s17 = smov 0   ;;  %s2475_s18 = smov 0  }
   0xd   :  { %s2477_s19 = smov 0   ;;  %s2479_s20 = smov 0  }
   0xe   :  { %s2481_s21 = smov 0   ;;  %s2483_s22 = smov 0  }
   0xf LB: > { %3000 = sst [smem:[#allocation8_spill]] %s2350_s29  ;;  %s1871_s23 = sadd.s32 4294967295, %s2386_s22   ;;  %s2386_s22 = sphi %s2483_s22, %s27_s22   ;;  %s2382_s21 = sphi %s2481_s21, %s3031_s21   ;;  %s2378_s20 = sphi %s2479_s20, %s3030_s20   ;;  %s2374_s19 = sphi %s2477_s19, %s3029_s19   ;;  %s2370_s18 = sphi %s2475_s18, %s3028_s18   ;;  %s2366_s17 = sphi %s2473_s17, %s3027_s17   ;;  %s2362_s16 = sphi %s2471_s16, %s3026_s16   ;;  %s2358_s15 = sphi %s2469_s15, %s3034_s15   ;;  %s2354_s30 = sphi %s2467_s30, %s3033_s30   ;;  %s2350_s29 = sphi %s2465_s29, %s3032_s29  }
  0x10   : > { %3001 = sst [smem:[#allocation9_spill]] %s2366_s17  ;;  %s1872_s24 = sadd.s32 4294967294, %s2386_s22  }
  0x11   : > { %3002 = sst [smem:[#allocation10_spill]] %s2378_s20  ;;  %s36_s25 = sadd.s32 1, %s2378_s20 }
  0x12   : > { %3003 = sst [smem:[#allocation11_spill]] %s2382_s21  ;;  %s39_s26 = sadd.s32 1, %s2382_s21 }
  0x13   : > { %p37_p0 = scmp.ge.s32.totalorder %s36_s25, 2  ;;  %s48_s27 = sadd.s32 1, %s2366_s17 }
  0x14   : > { %p55_p1 = scmp.ne.s32.totalorder %s2366_s17, %s2362_s16  ;;  %p56_p2 = scmp.eq.s32.totalorder %s2386_s22, 0 }
  0x15   : > { %s3036_s25 = smov (%p37_p0, %s36_s25), 0  ;;  %s3038_s26 = smov (!%p37_p0, %s39_s26), %s2382_s21 }
  0x16   : > { %3004 = sst [smem:[#allocation12_spill]] %s3036_s25  ;;  %s44_s28 = ssub.s32 %s2378_s20, %s3036_s25 }
  0x17   : > { %p2528_p3 = por %p56_p2, %p55_p1  ;;  %p41_p4 = scmp.ge.s32.totalorder %s3038_s26, 2 }
  0x18   : > { %s368_s13 = sadd.s32 1, %s2358_s15  ;;  %p378_p5 = scmp.ne.s32.totalorder %s2358_s15, %s2354_s30 }
  0x19   : > { %p379_p6 = scmp.eq.s32.totalorder %s1871_s23, 3  ;;  %s3040_s26 = smov (%p41_p4, %s3038_s26), 0 }
  0x1a   : > { %3006 = sst [smem:[#allocation13_spill]] %s3040_s26  ;;  %p384_p8 = scmp.ne.s32.totalorder %s2354_s30, %s2350_s29 }
  0x1b   : > { %p2537_p7 = por %p379_p6, %p378_p5  ;;  %s43_s10 = ssub.s32 %s2382_s21, %s3040_s26 }
  0x1c   : > { %p385_p9 = scmp.eq.s32.totalorder %s1872_s24, 3  ;;  %s45_s25 = sor.u32 %s44_s28, %s43_s10 }
  0x1d   : > { %p366_p10 = scmp.eq.s32.totalorder %s43_s10, 0  ;;  %p46_p11 = scmp.eq.s32.totalorder %s45_s25, 0 }
  0x1e   : > { %p2545_p12 = por %p385_p9, %p384_p8  ;;  %p1874_p13 = scmp.ge.s32.totalorder %s2386_s22, 4 }
  0x1f   : > { %s2550_s9 = scalar_select %p366_p10, %s2358_s15, %s368_s13  }
  0x20   : > { %s3008_s12 = scalar_select %p2545_p12, 1, 0 }
  0x21   : > { %s2553_s23 = scalar_select %p46_p11, %s2366_s17, %s48_s27  }
  0x22   : > { %3009 = sst [smem:[#allocation14_spill]] %s3008_s12  ;;  %431 = sbr.rel (%p1874_p13) target bundleno = 75 (0x4b), region = 56 }
  0x23   : > { %3010 = sst [smem:[#allocation15_spill]] %s2553_s23 }
  0x27   : > { %434 = sbr.rel (!%p2528_p3) target bundleno = 57 (0x39), region = 60  ;;  %s436_s24 = sand.u32 (%p2528_p3), 1, %s2366_s17  }
  0x28   : > { %s2097_s10 = sshll.u32 (%p2528_p3), %s2382_s21, 4  ;;  %s1875_s25 = sshll.u32 (%p2528_p3), %s436_s24, 5 }
  0x29   : > { %s441_s28 = sadd.s32 (%p2528_p3), %s2378_s20, %s2097_s10  ;;  %s3011_s0 = sld [smem:[#allocation16_spill]] (%p2528_p3) }
  0x2a   : > { %s1878_s26 = sshll.u32 (%p2528_p3), %s441_s28, 2  ;;  %s438_s27 = scalar_lea.vmem (%p2528_p3), [#allocation3], %s1875_s25 }
  0x2f   : > { %s443_s13 = scalar_lea.vmem %s3011_s0, %s1878_s26 }
  0x30   : > { %v460_v0 = vld [vmem:[%s443_s13] sm:$0xf]  ;;  %v462_v1 = vld [vmem:[%s443_s13 + $0x8] sm:$0xf]  ;;  %v464_v2 = vld [vmem:[%s443_s13 + $0x10] sm:$0xf] }
  0x31   : > { %461 = vst [vmem:[%s438_s27] sm:$0xf] %v460_v0  ;;  %v466_v3 = vld [vmem:[%s443_s13 + $0x18] sm:$0xf]  ;;  %v468_v4 = vld [vmem:[%s443_s13 + $0x20] sm:$0xf] }
  0x32   : > { %463 = vst [vmem:[%s438_s27 + $0x4] sm:$0xf] %v462_v1  ;;  %v470_v5 = vld [vmem:[%s443_s13 + $0x28] sm:$0xf]  ;;  %v472_v6 = vld [vmem:[%s443_s13 + $0x30] sm:$0xf] }
  0x33   : > { %465 = vst [vmem:[%s438_s27 + $0x8] sm:$0xf] %v464_v2  ;;  %v474_v7 = vld [vmem:[%s443_s13 + $0x38] sm:$0xf] }
  0x34   : > { %467 = vst [vmem:[%s438_s27 + $0xc] sm:$0xf] %v466_v3 }
  0x35   : > { %469 = vst [vmem:[%s438_s27 + $0x10] sm:$0xf] %v468_v4 }
  0x36   : > { %471 = vst [vmem:[%s438_s27 + $0x14] sm:$0xf] %v470_v5 }
  0x37   : > { %473 = vst [vmem:[%s438_s27 + $0x18] sm:$0xf] %v472_v6 }
  0x38   : > { %475 = vst [vmem:[%s438_s27 + $0x1c] sm:$0xf] %v474_v7 }
  0x39 PF: > { %537 = sbr.rel (!%p2528_p3) target bundleno = 75 (0x4b), region = 109  ;;  %s539_s12 = sand.u32 (%p2528_p3), 1, %s2366_s17  }
  0x3a   : > { %s2098_s29 = sshll.u32 (%p2528_p3), %s2382_s21, 4  ;;  %s1879_s26 = sshll.u32 (%p2528_p3), %s539_s12, 6 }
  0x3b   : > { %s544_s24 = sadd.s32 (%p2528_p3), %s2378_s20, %s2098_s29  ;;  %s3012_s3 = sld [smem:[#allocation17_spill]] (%p2528_p3) }
  0x3c   : > { %s1882_s10 = sshll.u32 (%p2528_p3), %s544_s24, 3  ;;  %s541_s13 = scalar_lea.vmem (%p2528_p3), [#allocation4], %s1879_s26 }
  0x41   : > { %s546_s0 = scalar_lea.vmem %s3012_s3, %s1882_s10 }
  0x42   : > { %v589_v8 = vld [vmem:[%s546_s0] sm:$0xff]  ;;  %v591_v9 = vld [vmem:[%s546_s0 + $0x10] sm:$0xff] }
  0x43   : > { %v593_v10 = vld [vmem:[%s546_s0 + $0x20] sm:$0xff]  ;;  %590 = vst [vmem:[%s541_s13] sm:$0xff] %v589_v8  ;;  %v595_v11 = vld [vmem:[%s546_s0 + $0x30] sm:$0xff] }
  0x44   : > { %592 = vst [vmem:[%s541_s13 + $0x8] sm:$0xff] %v591_v9  ;;  %v597_v12 = vld [vmem:[%s546_s0 + $0x40] sm:$0xff]  ;;  %v599_v13 = vld [vmem:[%s546_s0 + $0x50] sm:$0xff] }
  0x45   : > { %594 = vst [vmem:[%s541_s13 + $0x10] sm:$0xff] %v593_v10  ;;  %v601_v14 = vld [vmem:[%s546_s0 + $0x60] sm:$0xff]  ;;  %v603_v15 = vld [vmem:[%s546_s0 + $0x70] sm:$0xff] }
  0x46   : > { %596 = vst [vmem:[%s541_s13 + $0x18] sm:$0xff] %v595_v11 }
  0x47   : > { %598 = vst [vmem:[%s541_s13 + $0x20] sm:$0xff] %v597_v12 }
  0x48   : > { %600 = vst [vmem:[%s541_s13 + $0x28] sm:$0xff] %v599_v13 }
  0x49   : > { %602 = vst [vmem:[%s541_s13 + $0x30] sm:$0xff] %v601_v14 }
  0x4a   : > { %604 = vst [vmem:[%s541_s13 + $0x38] sm:$0xff] %v603_v15 }
  0x4b PF: > { %p1883_p0 = scmp.ge.s32.totalorder %s2386_s22, 1  ;;  %p609_p1 = scmp.lt.s32.totalorder %s2386_s22, 5 }
  0x4d   : > { %p610_p2 = pnand %p1883_p0, %p609_p1 }
  0x4e   : > { %s616_s14 = sand.u32 (!%p610_p2), 1, %s2362_s16   ;;  %s2990_s0 = sand.u32 (!%p610_p2), 1, %s2354_s30  }
  0x4f   : > { %613 = sbr.rel (%p610_p2) target bundleno = 966 (0x3c6), region = 147  ;;  %s1884_s27 = sshll.u32 (!%p610_p2), %s616_s14, 5 }
  0x50   : > { %s1885_s12 = sshll.u32 (!%p610_p2), %s616_s14, 6  ;;  %s2578_s29 = sshll.u32 (!%p610_p2), %s2990_s0, 3 }
  0x51   : > { %p689_p3 = scmp.lt.s32.totalorder (!%p610_p2), %s2370_s18, 1  ;;  %p691_p4 = scmp.lt.s32.totalorder (!%p610_p2), %s2374_s19, 1 }
  0x52   : > { %s2592_s14 = scalar_lea.vmem (!%p610_p2), [#allocation3], %s1884_s27  ;;  %s2594_s0 = scalar_lea.vmem (!%p610_p2), [#allocation4], %s1885_s12 }
  0x53   : > { %s687_s17 = scalar_lea.vmem (!%p610_p2), [#allocation5], %s2578_s29  ;;  %p1891_p5 = scmp.ne.s32.totalorder (!%p610_p2), %s2370_s18, 0 }
  0x54   : > { %s690_s26 = scalar_select %p689_p3, %s2370_s18, 1 }
  0x55   : > { %s692_s24 = scalar_select %p691_p4, %s2374_s19, 1 }
  0x56   : > { %s1887_s10 = sshll.u32 %s690_s26, 1  ;;  %709 = sbr.rel (%p1891_p5) target bundleno = 93 (0x5d), region = 159 }
  0x57   : > { %s694_s25 = sadd.s32 %s1887_s10, %s692_s24 }
  0x58   : > { %s1888_s28 = sshll.u32 %s694_s25, 2 }
  0x59   : > { %s696_s21 = scalar_lea.vmem %s2968_s1, %s1888_s28  ;;  %s2590_s23 = scalar_lea.vmem %s2969_s2, %s1888_s28 }
  0x5b   : > { %v2388_v16 = vmov 0.0  }
  0x5c   : > { %710 = vst [vmem:[#allocation2] sm:$0xff] %v2388_v16 }
  0x5d PF: > { %v2106_v17 = vld [vmem:[%s2971_s4 + $0x38] sm:$0xff]  ;;  %v2105_v20 = vld [vmem:[%s2971_s4 + $0x30] sm:$0xff]  ;;  %v2104_v23 = vld [vmem:[%s2971_s4 + $0x28] sm:$0xff]  ;;  %vm884_vm0 = vsmask.f32 256  ;;  %vm722_vm1 = vcmask 1040384  }
  0x5e   : > { %v2114_v18 = vld [vmem:[%s2971_s4 + $0x78] sm:$0xff]  ;;  %1205 = vmatpush.bf16.msra.mxu0 %v2106_v17  ;;  %v2113_v21 = vld [vmem:[%s2971_s4 + $0x70] sm:$0xff]  ;;  %2166 = vmatpush.bf16.msra.mxu3 %v2106_v17  ;;  %v2112_v24 = vld [vmem:[%s2971_s4 + $0x68] sm:$0xff]  ;;  %vm943_vm2 = vsmask.f32 3328  ;;  %vm727_vm3 = vcmask 1041409  }
  0x5f   : > { %v2122_v19 = vld [vmem:[%s2971_s4 + $0xb8] sm:$0xff]  ;;  %1234 = vmatpush.bf16.msra.mxu1 %v2114_v18  ;;  %v2121_v22 = vld [vmem:[%s2971_s4 + $0xb0] sm:$0xff]  ;;  %v2120_v25 = vld [vmem:[%s2971_s4 + $0xa8] sm:$0xff]  ;;  %vm942_vm4 = vcmask 1043456   ;;  %vm731_vm7 = vcmask 1042434   ;;  %vm735_vm8 = vcmask 1043459  }
  0x60   : > { %1263 = vmatpush.bf16.msra.mxu2 %v2122_v19  ;;  %v2626_v26 = vld [vmem:[%s2592_s14] sm:$0xff]   ;;  %v2628_v27 = vld [vmem:[%s696_s21] sm:$0xf]  ;;  %v2639_v32 = vld [vmem:[%s2592_s14 + $0x8] sm:$0xff]   ;;  %vm1416_vm9 = vcmask 1044484   ;;  %vm1418_vm10 = vcmask 1045509  }
  0x61   : > { %v2149_v28 = vunpack.c.l.b16 %v2626_v26  ;;  %v2150_v29 = vunpack.c.h.b16 %v2626_v26  ;;  %v2633_v30 = vrot.slane %v2628_v27, 3  ;;  %v2636_v31 = vld [vmem:[%s2590_s23] sm:$0xf]  ;;  %v2153_v36 = vunpack.c.l.b16 %v2639_v32  ;;  %v2102_v50 = vld [vmem:[%s2971_s4 + $0x18] sm:$0xff]  ;;  %vm2675_vm5 = vmand %vm722_vm1, %vm884_vm0  ;;  %p1996_p6 = scmp.ne.s32.totalorder %s2370_s18, 1 }
  0x62   : > { %1206 = vmatpush.bf16.msra.mxu0 %v2105_v20  ;;  %2167 = vmatpush.bf16.msra.mxu3 %v2105_v20  ;;  %v2103_v33 = vld [vmem:[%s2971_s4 + $0x20] sm:$0xff]  ;;  %v2648_v35 = vrot.slane %v2636_v31, 3  ;;  %v2154_v41 = vunpack.c.h.b16 %v2639_v32  ;;  %v2110_v51 = vld [vmem:[%s2971_s4 + $0x58] sm:$0xff]  ;;  %v2101_v2 = vld [vmem:[%s2971_s4 + $0x10] sm:$0xff]  ;;  %v2389_v20 = vmov 0   ;;  %vm1420_vm11 = vcmask 1046534  }
  0x63   : > { %1235 = vmatpush.bf16.msra.mxu1 %v2113_v21  ;;  %v2111_v34 = vld [vmem:[%s2971_s4 + $0x60] sm:$0xff]  ;;  %v725_v38 = vsel %vm722_vm1, %v2628_v27, %v2633_v30  ;;  %v811_v39 = vpack.c.b16 %v2149_v28, %v2149_v28  ;;  %v812_v40 = vpack.c.b16 %v2150_v29, %v2150_v29  ;;  %v728_v45 = vsel %vm727_vm3, %v2628_v27, %v2633_v30  ;;  %v2118_v56 = vld [vmem:[%s2971_s4 + $0x98] sm:$0xff]  ;;  %vm2684_vm6 = vmand %vm942_vm4, %vm943_vm2  ;;  %s3017_s3 = sld [smem:[#allocation18_spill]] (!%p1996_p6) }
  0x64   : > { %1264 = vmatpush.bf16.msra.mxu2 %v2121_v22  ;;  %v2119_v37 = vld [vmem:[%s2971_s4 + $0xa0] sm:$0xff]  ;;  %v740_v42 = vunpack.i.h.s16 %v725_v38  ;;  %v1892_v43 = vpack.i.b16 %v725_v38, %v725_v38  ;;  %v752_v44 = vsel %vm722_vm1, %v2636_v31, %v2648_v35  ;;  %v730_v1 = vrot.slane %v728_v45, 1  ;;  %v2109_v8 = vld [vmem:[%s2971_s4 + $0x50] sm:$0xff]  ;;  %v2694_v12 = vld [vmem:[%s2592_s14 + $0x10] sm:$0xff]   ;;  %2263 = vset.pattern.permute.xlu0 %v2389_v20  ;;  %s3018_s27 = sld [smem:[#allocation21_spill]] (!%p1996_p6) }
  0x65   : > { %v820_v46 = vshrl.u32 %v811_v39, 16  ;;  %v823_v47 = vshll.u32 %v811_v39, 16  ;;  %v827_v48 = vshrl.u32 %v812_v40, 16  ;;  %v830_v49 = vshll.u32 %v812_v40, 16  ;;  %v1300_v13 = vld [vmem:[%s2594_s0] sm:$0xff]  ;;  %v2117_v14 = vld [vmem:[%s2971_s4 + $0x90] sm:$0xff]  ;;  %2264 = vset.pattern.permute.xlu1 %v2389_v20  ;;  %2265 = vset.pattern.permute.xlu2 %v2389_v20 }
  0x66   : > { %1207 = vmatpush.bf16.msra.mxu0 %v2104_v23  ;;  %2168 = vmatpush.bf16.msra.mxu3 %v2104_v23  ;;  %v772_v52 = vpack.i.b16 %v740_v42, %v740_v42  ;;  %v779_v53 = vperm.slane %v1892_v43, 0  ;;  %v764_v54 = vunpack.i.h.s16 %v752_v44  ;;  %v1896_v55 = vpack.i.b16 %v752_v44, %v752_v44  ;;  %v2108_v28 = vld [vmem:[%s2971_s4 + $0x48] sm:$0xff]  ;;  %v2812_v7 = vld [vmem:[%s2972_s5] ss:$0 sm:$0xff]  ;;  %s3019_s12 = sld [smem:[#allocation19_spill]] (!%p1996_p6) }
  0x67   : > { %1236 = vmatpush.bf16.msra.mxu1 %v2112_v24  ;;  %v822_v57 = vrot.slane %v820_v46, 7  ;;  %v829_v58 = vrot.slane %v827_v48, 7  ;;  %v894_v59 = vrot.slane %v823_v47, 1  ;;  %v896_v60 = vrot.slane %v830_v49, 1  ;;  %1311 = vperm.xlu0 %2263, %v1300_v13   ;;  %s3020_s21 = sld [smem:[#allocation20_spill]] (!%p1996_p6) }
  0x68   : > { %1265 = vmatpush.bf16.msra.mxu2 %v2120_v25  ;;  %v780_v61 = vperm.slane %v772_v52, 0  ;;  %v919_v63 = vpack.i.b16 %v764_v54, %v764_v54  ;;  %v926_v0 = vperm.slane %v1896_v55, 0  ;;  %v742_v10 = vunpack.i.h.s16 %v730_v1  ;;  %v2100_v25 = vld [vmem:[%s2971_s4 + $0x8] sm:$0xff]  ;;  %v1301_v55 = vld [vmem:[%s2594_s0 + $0x8] sm:$0xff] }
  0x69   : > { %v825_v3 = vor.u32 %v823_v47, %v822_v57  ;;  %v832_v4 = vor.u32 %v830_v49, %v829_v58  ;;  %v895_v5 = vor.u32 %v894_v59, %v820_v46  ;;  %v897_v6 = vor.u32 %v896_v60, %v827_v48 }
  0x6a   : > { %1208 = vmatpush.bf16.msra.mxu0 %v2103_v33  ;;  %2169 = vmatpush.bf16.msra.mxu3 %v2103_v33  ;;  %v927_v9 = vperm.slane %v919_v63, 0  ;;  %v2691_v11 = vpack.c.b16 %v2153_v36, %v2153_v36  ;;  %v1893_v19 = vpack.i.b16 %v730_v1, %v730_v1  ;;  %v774_v22 = vpack.i.b16 %v742_v10, %v742_v10 }
  0x6b   : > { %1237 = vmatpush.bf16.msra.mxu1 %v2111_v34  ;;  %v886_v15 = vsel %vm2675_vm5, %v779_v53, %v825_v3  ;;  %v887_v16 = vsel %vm2675_vm5, %v780_v61, %v832_v4  ;;  %v945_v17 = vsel %vm2684_vm6, %v895_v5, %v926_v0  ;;  %v2708_v23 = vpack.c.b16 %v2154_v41, %v2154_v41 }
  0x6c   : > { %1266 = vmatpush.bf16.msra.mxu2 %v2119_v37  ;;  %v946_v18 = vsel %vm2684_vm6, %v897_v6, %v927_v9  ;;  %v969_v21 = vunpack.c.l.b16 %v886_v15  ;;  %v2157_v24 = vunpack.c.l.b16 %v2694_v12  ;;  %v971_v29 = vunpack.c.l.b16 %v887_v16  ;;  %v2116_v37 = vld [vmem:[%s2971_s4 + $0x88] sm:$0xff] }
  0x6d   : > { %v834_v33 = vshrl.u32 %v2691_v11, 16  ;;  %v837_v34 = vshll.u32 %v2691_v11, 16  ;;  %v754_v36 = vsel %vm727_vm3, %v2636_v31, %v2648_v35  ;;  %v970_v38 = vunpack.c.l.b16 %v945_v17  ;;  %v2756_v17 = vld [vmem:[%s2592_s14 + $0x18] sm:$0xff]   ;;  %s3021_s14 = sld [smem:[#allocation22_spill]] (!%p1996_p6) }
  0x6e   : > { %1209 = vmatpush.bf16.msra.mxu0 %v2102_v50  ;;  %2170 = vmatpush.bf16.msra.mxu3 %v2102_v50  ;;  %v972_v39 = vunpack.c.l.b16 %v946_v18  ;;  %v841_v40 = vshrl.u32 %v2708_v23, 16  ;;  %v844_v41 = vshll.u32 %v2708_v23, 16  ;;  %v781_v42 = vperm.slane %v1893_v19, 0  ;;  %v2099_v50 = vld [vmem:[%s2971_s4] sm:$0xff] }
  0x6f   : > { %1238 = vmatpush.bf16.msra.mxu1 %v2110_v51  ;;  %v836_v43 = vrot.slane %v834_v33, 7  ;;  %v756_v44 = vrot.slane %v754_v36, 1  ;;  %v2158_v45 = vunpack.c.h.b16 %v2694_v12  ;;  %v782_v46 = vperm.slane %v774_v22, 0  ;;  %v2107_v51 = vld [vmem:[%s2971_s4 + $0x40] sm:$0xff]  ;;  %1316 = vperm.xlu0 %2263, %v1301_v55  }
  0x70   : > { %1267 = vmatpush.bf16.msra.mxu2 %v2118_v56  ;;  %v843_v47 = vrot.slane %v841_v40, 7  ;;  %v732_v48 = vsel %vm731_vm7, %v2628_v27, %v2633_v30  ;;  %v2731_v49 = vpack.c.b16 %v2157_v24, %v2157_v24  ;;  %v1037_v52 = vpack.c.b16 %v971_v29, %v969_v21  ;;  %v2115_v56 = vld [vmem:[%s2971_s4 + $0x80] sm:$0xff] }
  0x71   : > { %v839_v53 = vor.u32 %v837_v34, %v836_v43  ;;  %v766_v54 = vunpack.i.h.s16 %v756_v44  ;;  %v1039_v57 = vpack.c.b16 %v972_v39, %v970_v38  ;;  %v898_v59 = vrot.slane %v837_v34, 1 }
  0x72   : > { %1210 = vmatpush.bf16.msra.mxu0 %v2101_v2  ;;  %2171 = vmatpush.bf16.msra.mxu3 %v2101_v2  ;;  %v846_v58 = vor.u32 %v844_v41, %v843_v47  ;;  %v734_v60 = vrot.slane %v732_v48, 2  ;;  %v900_v63 = vrot.slane %v844_v41, 1  ;;  %v2745_v0 = vpack.c.b16 %v2158_v45, %v2158_v45  ;;  %v1303_v45 = vld [vmem:[%s2594_s0 + $0x18] sm:$0xff] }
  0x73   : > { %1239 = vmatpush.bf16.msra.mxu1 %v2109_v8  ;;  %v888_v61 = vsel %vm2675_vm5, %v781_v42, %v839_v53  ;;  %v848_v1 = vshrl.u32 %v2731_v49, 16  ;;  %v1897_v4 = vpack.i.b16 %v756_v44, %v756_v44  ;;  %v921_v8 = vpack.i.b16 %v766_v54, %v766_v54 }
  0x74   : > { %1268 = vmatpush.bf16.msra.mxu2 %v2117_v14  ;;  %v889_v2 = vsel %vm2675_vm5, %v782_v46, %v846_v58  ;;  %v973_v3 = vunpack.c.l.b16 %v888_v61  ;;  %v744_v5 = vunpack.i.h.s16 %v734_v60  ;;  %v1894_v9 = vpack.i.b16 %v734_v60, %v734_v60 }
  0x75   : > { %v975_v6 = vunpack.c.l.b16 %v889_v2  ;;  %v850_v10 = vrot.slane %v848_v1, 7  ;;  %v851_v13 = vshll.u32 %v2731_v49, 16  ;;  %v855_v15 = vshrl.u32 %v2745_v0, 16 }
  0x76   : > { %1211 = vmatpush.bf16.msra.mxu0 %v2100_v25  ;;  %2172 = vmatpush.bf16.msra.mxu3 %v2100_v25  ;;  %v776_v11 = vpack.i.b16 %v744_v5, %v744_v5  ;;  %v858_v16 = vshll.u32 %v2745_v0, 16  ;;  %v899_v18 = vor.u32 %v898_v59, %v834_v33  ;;  %v901_v19 = vor.u32 %v900_v63, %v841_v40  ;;  %v1302_v25 = vld [vmem:[%s2594_s0 + $0x10] sm:$0xff] }
  0x77   : > { %1240 = vmatpush.bf16.msra.mxu1 %v2108_v28  ;;  %v1040_v14 = vpack.c.b16 %v975_v6, %v973_v3  ;;  %v928_v20 = vperm.slane %v1897_v4, 0  ;;  %v929_v21 = vperm.slane %v921_v8, 0  ;;  %v783_v22 = vperm.slane %v1894_v9, 0  ;;  %1321 = vperm.xlu1 %2264, %v1302_v25   ;;  %v1306_v8 = vld [vmem:[%s2594_s0 + $0x30] sm:$0xff]  ;;  %v1307_v9 = vld [vmem:[%s2594_s0 + $0x38] sm:$0xff] }
  0x78   : > { %1269 = vmatpush.bf16.msra.mxu2 %v2116_v37  ;;  %v853_v23 = vor.u32 %v851_v13, %v850_v10  ;;  %v857_v24 = vrot.slane %v855_v15, 7  ;;  %v784_v28 = vperm.slane %v776_v11, 0  ;;  %v757_v29 = vsel %vm731_vm7, %v2636_v31, %v2648_v35  ;;  %v1304_v10 = vld [vmem:[%s2594_s0 + $0x20] sm:$0xff]  ;;  %1341 = vperm.xlu0 %2263, %v1306_v8  }
  0x79   : > { %v2161_v34 = vunpack.c.l.b16 %v2756_v17  ;;  %v947_v36 = vsel %vm2684_vm6, %v899_v18, %v928_v20  ;;  %v948_v37 = vsel %vm2684_vm6, %v901_v19, %v929_v21  ;;  %v759_v39 = vrot.slane %v757_v29, 2  ;;  %1331 = vperm.xlu2 %2265, %v1304_v10   ;;  %v1305_v20 = vld [vmem:[%s2594_s0 + $0x28] sm:$0xff] }
  0x7a   : > { %1212 = vmatpush.bf16.msra.mxu0 %v2099_v50  ;;  %2173 = vmatpush.bf16.msra.mxu3 %v2099_v50  ;;  %v860_v33 = vor.u32 %v858_v16, %v857_v24  ;;  %v890_v38 = vsel %vm2675_vm5, %v783_v22, %v853_v23  ;;  %v736_v40 = vsel %vm735_vm8, %v2628_v27, %v2633_v30  ;;  %v974_v46 = vunpack.c.l.b16 %v947_v36 }
  0x7b   : > { %1241 = vmatpush.bf16.msra.mxu1 %v2107_v51  ;;  %v738_v42 = vrot.slane %v736_v40, 3  ;;  %v2776_v43 = vpack.c.b16 %v2161_v34, %v2161_v34  ;;  %v976_v47 = vunpack.c.l.b16 %v948_v37  ;;  %v977_v48 = vunpack.c.l.b16 %v890_v38 }
  0x7c   : > { %1270 = vmatpush.bf16.msra.mxu2 %v2115_v56  ;;  %v891_v41 = vsel %vm2675_vm5, %v784_v28, %v860_v33  ;;  %v768_v51 = vunpack.i.h.s16 %v759_v39  ;;  %v902_v30 = vrot.slane %v851_v13, 1  ;;  %v904_v55 = vrot.slane %v858_v16, 1 }
  0x7d   : > { %1213 = vmatmul.bf16.vlgmr.msra.gmra.mxu0 %v1037_v52  ;;  %1218 = vmatmul.bf16.vlgmr.msra.gmra.mxu3 %v1040_v14  ;;  %v979_v50 = vunpack.c.l.b16 %v891_v41  ;;  %v746_v52 = vunpack.i.h.s16 %v738_v42  ;;  %v862_v53 = vshrl.u32 %v2776_v43, 16  ;;  %v1042_v27 = vpack.c.b16 %v976_v47, %v974_v46 }
  0x7e   : > { %1242 = vmatmul.bf16.vlgmr.msra.gmra.mxu1 %v2626_v26  ;;  %v2162_v26 = vunpack.c.h.b16 %v2756_v17  ;;  %v1898_v56 = vpack.i.b16 %v759_v39, %v759_v39  ;;  %v923_v58 = vpack.i.b16 %v768_v51, %v768_v51  ;;  %v865_v59 = vshll.u32 %v2776_v43, 16 }
  0x7f   : > { %1271 = vmatmul.bf16.vlgmr.msra.gmra.mxu2 %v1039_v57  ;;  %1326 = vperm.xlu1 %2264, %v1303_v45   ;;  %v1043_v57 = vpack.c.b16 %v979_v50, %v977_v48  ;;  %v1895_v61 = vpack.i.b16 %v738_v42, %v738_v42  ;;  %v778_v63 = vpack.i.b16 %v746_v52, %v746_v52  ;;  %v864_v0 = vrot.slane %v862_v53, 7 }
  0x80   : > { %v2778_v44 = vpack.c.b16 %v2162_v26, %v2162_v26  ;;  %v903_v3 = vor.u32 %v902_v30, %v848_v1  ;;  %v905_v4 = vor.u32 %v904_v55, %v855_v15  ;;  %v930_v5 = vperm.slane %v1898_v56, 0 }
  0x81   : > { %v931_v6 = vperm.slane %v923_v58, 0  ;;  %v785_v11 = vperm.slane %v1895_v61, 0  ;;  %v786_v13 = vperm.slane %v778_v63, 0  ;;  %v867_v14 = vor.u32 %v865_v59, %v864_v0  ;;  %1336 = vperm.xlu2 %2265, %v1305_v20  }
  0x82   : > { %v869_v54 = vshrl.u32 %v2778_v44, 16  ;;  %v872_v60 = vshll.u32 %v2778_v44, 16  ;;  %v949_v49 = vsel %vm2684_vm6, %v903_v3, %v930_v5  ;;  %v906_v28 = vrot.slane %v865_v59, 1 }
  0x83   : > { %v950_v1 = vsel %vm2684_vm6, %v905_v4, %v931_v6  ;;  %v892_v15 = vsel %vm2675_vm5, %v785_v11, %v867_v14  ;;  %v978_v21 = vunpack.c.l.b16 %v949_v49  ;;  %vm1422_vm12 = vcmask 1047559  }
  0x84   : > { %v871_v2 = vrot.slane %v869_v54, 7  ;;  %v980_v22 = vunpack.c.l.b16 %v950_v1  ;;  %v981_v23 = vunpack.c.l.b16 %v892_v15  ;;  %v908_v29 = vrot.slane %v872_v60, 1 }
  0x85   : > { %v907_v62 = vor.u32 %v906_v28, %v862_v53 }
  0x86   : > { %v874_v16 = vor.u32 %v872_v60, %v871_v2  ;;  %v909_v33 = vor.u32 %v908_v29, %v869_v54 }
  0x87   : > { %1346 = vperm.xlu1 %2264, %v1307_v9  }
  0x88   : > { %v893_v18 = vsel %vm2675_vm5, %v786_v13, %v874_v16 }
  0x89   : > { %v983_v24 = vunpack.c.l.b16 %v893_v18 }
  0x8b   : > { %v1046_v25 = vpack.c.b16 %v983_v24, %v981_v23 }
  0x8d   : > { %1223 = vmatmul.bf16.gmra.mxu3 %v1043_v57 }
  0x8e   : > { %1247 = vmatmul.bf16.gmra.mxu1 %v2639_v32  ;;  %v760_v32 = vsel %vm735_vm8, %v2636_v31, %v2648_v35  ;;  %v1045_v35 = vpack.c.b16 %v980_v22, %v978_v21 }
  0x8f   : > { %1276 = vmatmul.bf16.gmra.mxu2 %v1042_v27  ;;  %v762_v19 = vrot.slane %v760_v32, 3 }
  0x91   : > { %v770_v31 = vunpack.i.h.s16 %v762_v19  ;;  %v1899_v34 = vpack.i.b16 %v762_v19, %v762_v19 }
  0x93   : > { %v925_v26 = vpack.i.b16 %v770_v31, %v770_v31  ;;  %v932_v36 = vperm.slane %v1899_v34, 0 }
  0x95   : > { %v933_v37 = vperm.slane %v925_v26, 0  ;;  %v951_v38 = vsel %vm2684_vm6, %v907_v62, %v932_v36 }
  0x96   : > { %v982_v40 = vunpack.c.l.b16 %v951_v38 }
  0x97   : > { %v952_v39 = vsel %vm2684_vm6, %v909_v33, %v933_v37 }
  0x98   : > { %v984_v41 = vunpack.c.l.b16 %v952_v39 }
  0x9a   : > { %v1048_v42 = vpack.c.b16 %v984_v41, %v982_v40 }
  0x9d   : > { %1228 = vmatmul.bf16.gmra.mxu3 %v1046_v25 }
  0x9e   : > { %1252 = vmatmul.bf16.gmra.mxu1 %v2694_v12 }
  0x9f   : > { %1281 = vmatmul.bf16.gmra.mxu2 %v1045_v35 }
  0xae   : > { %1257 = vmatmul.bf16.gmra.mxu1 %v2756_v17 }
  0xaf   : > { %1286 = vmatmul.bf16.gmra.mxu2 %v1048_v42 }
  0xd3   : > { %v1332_v5 = vpop.permute.xlu2 %1331 }
  0xd9   : > { %v1312_v57 = vpop.permute.xlu0 %1311 }
  0xdb   : > { %v1337_v29 = vpop.permute.xlu2 %1336 }
  0xe1   : > { %v1317_v49 = vpop.permute.xlu0 %1316 }
  0xe9   : > { %v1322_v59 = vpop.permute.xlu1 %1321 }
  0xf1   : > { %v1327_v19 = vpop.permute.xlu1 %1326 }
  0xfa   : > { %v1214_v50 = vpop.f32.mrf.mxu0 }
  0xfb   : > { %v1243_v43 = vpop.f32.mrf.mxu1  ;;  %v1215_v55 = vadd.f32 %v2812_v7, %v1214_v50 }
  0xfd   : > { %v1244_v63 = vadd.f32 %v1243_v43, %v1215_v55 }
 0x100   : > { %v1219_v44 = vpop.f32.mrf.mxu3 }
 0x101   : > { %v1220_v30 = vadd.f32 %v2812_v7, %v1219_v44 }
 0x102   : > { %v1272_v12 = vpop.f32.mrf.mxu2  ;;  %v1216_v54 = vpop.f32.mrf.mxu0 }
 0x103   : > { %v1245_v45 = vpop.f32.mrf.mxu1  ;;  %v1217_v56 = vadd.f32 %v2812_v7, %v1216_v54  ;;  %v1273_v11 = vadd.f32 %v1272_v12, %v1244_v63 }
 0x105   : > { %v1246_v0 = vadd.f32 %v1245_v45, %v1217_v56  ;;  %v1292_v15 = vmax.f32 %v1273_v11, 0.0 }
 0x107   : > { %v1349_v34 = vmul.f32 %v1312_v57, %v1292_v15 }
 0x108   : > { %v1221_v48 = vpop.f32.mrf.mxu3 }
 0x109   : > { %v1222_v2 = vadd.f32 %v2812_v7, %v1221_v48  ;;  %v1357_v40 = vrot.slane %v1349_v34, 4 }
 0x10a   : > { %v1274_v46 = vpop.f32.mrf.mxu2 }
 0x10b   : > { %v1248_v47 = vpop.f32.mrf.mxu1  ;;  %v1275_v6 = vadd.f32 %v1274_v46, %v1246_v0  ;;  %v1358_v48 = vadd.f32 %v1357_v40, %v1349_v34  ;;  %v1308_v40 = vld [vmem:[#allocation2] sm:$0xff] }
 0x10c   : > { %v1249_v60 = vadd.f32 %v1248_v47, %v1220_v30 }
 0x10d   : > { %v1293_v16 = vmax.f32 %v1275_v6, 0.0  ;;  %v1359_v57 = vrot.slane %v1358_v48, 2 }
 0x10f   : > { %v1350_v24 = vmul.f32 %v1317_v49, %v1293_v16  ;;  %v1360_v6 = vadd.f32 %v1359_v57, %v1358_v48 }
 0x110   : > { %v1224_v53 = vpop.f32.mrf.mxu3 }
 0x111   : > { %v1225_v58 = vadd.f32 %v2812_v7, %v1224_v53  ;;  %v1363_v36 = vrot.slane %v1350_v24, 4  ;;  %v1342_v53 = vpop.permute.xlu0 %1341 }
 0x112   : > { %v1277_v51 = vpop.f32.mrf.mxu2 }
 0x113   : > { %v1250_v52 = vpop.f32.mrf.mxu1  ;;  %v1278_v10 = vadd.f32 %v1277_v51, %v1249_v60  ;;  %v1364_v12 = vadd.f32 %v1363_v36, %v1350_v24 }
 0x114   : > { %v1251_v8 = vadd.f32 %v1250_v52, %v1222_v2 }
 0x115   : > { %v1294_v1 = vmax.f32 %v1278_v10, 0.0 }
 0x117   : > { %v1351_v25 = vmul.f32 %v1322_v59, %v1294_v1  ;;  %v1361_v1 = vrot.slane %v1360_v6, 1 }
 0x118   : > { %v1226_v61 = vpop.f32.mrf.mxu3 }
 0x119   : > { %v1227_v32 = vadd.f32 %v2812_v7, %v1226_v61  ;;  %v1369_v39 = vrot.slane %v1351_v25, 4 }
 0x11a   : > { %v1279_v27 = vpop.f32.mrf.mxu2 }
 0x11b   : > { %v1253_v17 = vpop.f32.mrf.mxu1  ;;  %v1280_v13 = vadd.f32 %v1279_v27, %v1251_v8  ;;  %v1370_v46 = vadd.f32 %v1369_v39, %v1351_v25  ;;  %v1365_v27 = vrot.slane %v1364_v12, 2 }
 0x11c   : > { %v1254_v3 = vadd.f32 %v1253_v17, %v1225_v58 }
 0x11d   : > { %v1295_v18 = vmax.f32 %v1280_v13, 0.0  ;;  %v1371_v56 = vrot.slane %v1370_v46, 2  ;;  %v1366_v0 = vadd.f32 %v1365_v27, %v1364_v12  ;;  %v1347_v13 = vpop.permute.xlu1 %1346 }
 0x11f   : > { %v1352_v26 = vmul.f32 %v1327_v19, %v1295_v18 }
 0x120   : > { %v1229_v22 = vpop.f32.mrf.mxu3 }
 0x121   : > { %v1230_v31 = vadd.f32 %v2812_v7, %v1229_v22  ;;  %v1375_v41 = vrot.slane %v1352_v26, 4 }
 0x122   : > { %v1282_v4 = vpop.f32.mrf.mxu2 }
 0x123   : > { %v1255_v9 = vpop.f32.mrf.mxu1  ;;  %v1283_v14 = vadd.f32 %v1282_v4, %v1254_v3  ;;  %v1376_v50 = vadd.f32 %v1375_v41, %v1352_v26 }
 0x124   : > { %v1256_v20 = vadd.f32 %v1255_v9, %v1227_v32 }
 0x125   : > { %v1296_v21 = vmax.f32 %v1283_v14, 0.0  ;;  %v1377_v58 = vrot.slane %v1376_v50, 2 }
 0x127   : > { %v1353_v33 = vmul.f32 %v1332_v5, %v1296_v21  ;;  %v1372_v5 = vadd.f32 %v1371_v56, %v1370_v46  ;;  %v1378_v8 = vadd.f32 %v1377_v58, %v1376_v50 }
 0x128   : > { %v1231_v47 = vpop.f32.mrf.mxu3 }
 0x129   : > { %v1381_v42 = vrot.slane %v1353_v33, 4  ;;  %v1232_v30 = vadd.f32 %v2812_v7, %v1231_v47  ;;  %v1367_v7 = vrot.slane %v1366_v0, 1  ;;  %v1373_v32 = vrot.slane %v1372_v5, 1 }
 0x12a   : > { %v1284_v23 = vpop.f32.mrf.mxu2  ;;  %v1379_v15 = vrot.slane %v1378_v8, 1 }
 0x12b   : > { %v1285_v35 = vadd.f32 %v1284_v23, %v1256_v20  ;;  %v1258_v28 = vpop.f32.mrf.mxu1  ;;  %v1382_v52 = vadd.f32 %v1381_v42, %v1353_v33  ;;  %v1368_v20 = vadd.f32 %v1367_v7, %v1366_v0  ;;  %v1374_v23 = vadd.f32 %v1373_v32, %v1372_v5 }
 0x12c   : > { %v1259_v37 = vadd.f32 %v1258_v28, %v1230_v31  ;;  %v1362_v31 = vadd.f32 %v1361_v1, %v1360_v6 }
 0x12d   : > { %v1297_v62 = vmax.f32 %v1285_v35, 0.0  ;;  %v1383_v61 = vrot.slane %v1382_v52, 2  ;;  %v1380_v35 = vadd.f32 %v1379_v15, %v1378_v8 }
 0x12f   : > { %v1354_v38 = vmul.f32 %v1337_v29, %v1297_v62  ;;  %v1384_v11 = vadd.f32 %v1383_v61, %v1382_v52  ;;  %v1413_v29 = vsel %vm727_vm3, %v1368_v20, %v1362_v31 }
 0x130   : > { %v1414_v62 = vsel %vm731_vm7, %v1374_v23, %v1413_v29 }
 0x131   : > { %v1387_v44 = vrot.slane %v1354_v38, 4  ;;  %v1385_v19 = vrot.slane %v1384_v11, 1  ;;  %v1415_v36 = vsel %vm735_vm8, %v1380_v35, %v1414_v62 }
 0x132   : > { %v1287_v43 = vpop.f32.mrf.mxu2 }
 0x133   : > { %v1288_v45 = vadd.f32 %v1287_v43, %v1259_v37  ;;  %v1260_v54 = vpop.f32.mrf.mxu1  ;;  %v1388_v17 = vadd.f32 %v1387_v44, %v1354_v38  ;;  %v1386_v28 = vadd.f32 %v1385_v19, %v1384_v11 }
 0x134   : > { %v1261_v60 = vadd.f32 %v1260_v54, %v1232_v30 }
 0x135   : > { %v1298_v51 = vmax.f32 %v1288_v45, 0.0  ;;  %v1389_v2 = vrot.slane %v1388_v17, 2  ;;  %v1417_v38 = vsel %vm1416_vm9, %v1386_v28, %v1415_v36 }
 0x137   : > { %v1355_v55 = vmul.f32 %v1342_v53, %v1298_v51  ;;  %v1390_v14 = vadd.f32 %v1389_v2, %v1388_v17 }
 0x139   : > { %v1393_v59 = vrot.slane %v1355_v55, 4  ;;  %v1391_v21 = vrot.slane %v1390_v14, 1 }
 0x13a   : > { %v1289_v63 = vpop.f32.mrf.mxu2 }
 0x13b   : > { %v1394_v3 = vadd.f32 %v1393_v59, %v1355_v55  ;;  %v1290_v4 = vadd.f32 %v1289_v63, %v1261_v60  ;;  %v1392_v34 = vadd.f32 %v1391_v21, %v1390_v14 }
 0x13d   : > { %v1395_v9 = vrot.slane %v1394_v3, 2  ;;  %v1299_v10 = vmax.f32 %v1290_v4, 0.0  ;;  %v1419_v39 = vsel %vm1418_vm10, %v1392_v34, %v1417_v38 }
 0x13f   : > { %v1356_v16 = vmul.f32 %v1347_v13, %v1299_v10  ;;  %v1396_v49 = vadd.f32 %v1395_v9, %v1394_v3 }
 0x141   : > { %v1399_v18 = vrot.slane %v1356_v16, 4  ;;  %v1397_v24 = vrot.slane %v1396_v49, 1 }
 0x143   : > { %v1400_v22 = vadd.f32 %v1399_v18, %v1356_v16  ;;  %v1398_v33 = vadd.f32 %v1397_v24, %v1396_v49 }
 0x145   : > { %v1401_v25 = vrot.slane %v1400_v22, 2  ;;  %v1421_v42 = vsel %vm1420_vm11, %v1398_v33, %v1419_v39 }
 0x147   : > { %v1402_v26 = vadd.f32 %v1401_v25, %v1400_v22 }
 0x149   : > { %v1403_v37 = vrot.slane %v1402_v26, 1 }
 0x14b   : > { %v1404_v41 = vadd.f32 %v1403_v37, %v1402_v26 }
 0x14c   : > { %1430 = sbr.rel (%p1996_p6) target bundleno = 946 (0x3b2), region = 163 }
 0x14d   : > { %v1423_v43 = vsel %vm1422_vm12, %v1404_v41, %v1421_v42 }
 0x14e   : > { %v1425_v12 = vadd.f32 %v1423_v43, %v1308_v40 }
 0x150   : > { %1426 = vst [vmem:[#allocation2] sm:$0xff] %v1425_v12 }
 0x151   : > { %v2130_v44 = vld [vmem:[%s2973_s6 + $0x38] sm:$0xff]  ;;  %v2129_v45 = vld [vmem:[%s2973_s6 + $0x30] sm:$0xff]  ;;  %v2128_v48 = vld [vmem:[%s2973_s6 + $0x28] sm:$0xff] }
 0x152   : > { %1501 = vmatpush.bf16.msra.mxu0 %v2130_v44  ;;  %v2138_v46 = vld [vmem:[%s2975_s8 + $0x38] sm:$0xff]  ;;  %v2137_v47 = vld [vmem:[%s2975_s8 + $0x30] sm:$0xff]  ;;  %v2127_v50 = vld [vmem:[%s2973_s6 + $0x20] sm:$0xff] }
 0x153   : > { %1592 = vmatpush.bf16.msra.mxu1 %v2138_v46  ;;  %v2126_v51 = vld [vmem:[%s2973_s6 + $0x18] sm:$0xff]  ;;  %v2125_v52 = vld [vmem:[%s2973_s6 + $0x10] sm:$0xff]  ;;  %v2124_v53 = vld [vmem:[%s2973_s6 + $0x8] sm:$0xff] }
 0x154   : > { %v2123_v54 = vld [vmem:[%s2973_s6] sm:$0xff]  ;;  %v2136_v30 = vld [vmem:[%s2975_s8 + $0x28] sm:$0xff]  ;;  %v2134_v56 = vld [vmem:[%s2975_s8 + $0x18] sm:$0xff] }
 0x155   : > { %v2135_v55 = vld [vmem:[%s2975_s8 + $0x20] sm:$0xff]  ;;  %v2133_v57 = vld [vmem:[%s2975_s8 + $0x10] sm:$0xff]  ;;  %v2132_v58 = vld [vmem:[%s2975_s8 + $0x8] sm:$0xff] }
 0x156   : > { %1502 = vmatpush.bf16.msra.mxu0 %v2129_v45  ;;  %v2131_v59 = vld [vmem:[%s2975_s8] sm:$0xff]  ;;  %v2146_v15 = vld [vmem:[%s3018_s27 + $0x38] sm:$0xff]  ;;  %v2145_v18 = vld [vmem:[%s3018_s27 + $0x30] sm:$0xff] }
 0x157   : > { %1593 = vmatpush.bf16.msra.mxu1 %v2137_v47  ;;  %v1431_v27 = vld [vmem:[#allocation2] sm:$0xff]  ;;  %1707 = vmatpush.bf16.msra.mxu2 %v2146_v15  ;;  %v2144_v19 = vld [vmem:[%s3018_s27 + $0x28] sm:$0xff]  ;;  %v2142_v21 = vld [vmem:[%s3018_s27 + $0x18] sm:$0xff] }
 0x158   : > { %v1432_v17 = vpack.c.bf16 %v1431_v27, %v1431_v27  ;;  %v2267_v60 = vld [vmem:[%s2974_s7] ss:$0 sm:$0xff]  ;;  %v2141_v22 = vld [vmem:[%s3018_s27 + $0x10] sm:$0xff]  ;;  %v2140_v23 = vld [vmem:[%s3018_s27 + $0x8] sm:$0xff] }
 0x159   : > { %v2268_v7 = vld [vmem:[%s3017_s3] ss:$0 sm:$0xff] }
 0x15a   : > { %1503 = vmatpush.bf16.msra.mxu0 %v2128_v48  ;;  %v2143_v20 = vld [vmem:[%s3018_s27 + $0x20] sm:$0xff] }
 0x15b   : > { %1594 = vmatpush.bf16.msra.mxu1 %v2136_v30  ;;  %1708 = vmatpush.bf16.msra.mxu2 %v2145_v18  ;;  %v2139_v31 = vld [vmem:[%s3018_s27] sm:$0xff] }
 0x15c   : > { %v2269_v41 = vld [vmem:[%s3019_s12] ss:$0 sm:$0xff] }
 0x15d   : > { %v2270_v12 = vld [vmem:[%s3020_s21] ss:$0 sm:$0xff] }
 0x15e   : > { %1504 = vmatpush.bf16.msra.mxu0 %v2127_v50  ;;  %v2271_v47 = vld [vmem:[%s3021_s14] ss:$0 sm:$0xff] }
 0x15f   : > { %1595 = vmatpush.bf16.msra.mxu1 %v2135_v55  ;;  %1709 = vmatpush.bf16.msra.mxu2 %v2144_v19 }
 0x162   : > { %1505 = vmatpush.bf16.msra.mxu0 %v2126_v51 }
 0x163   : > { %1596 = vmatpush.bf16.msra.mxu1 %v2134_v56  ;;  %1710 = vmatpush.bf16.msra.mxu2 %v2143_v20 }
 0x166   : > { %1506 = vmatpush.bf16.msra.mxu0 %v2125_v52 }
 0x167   : > { %1597 = vmatpush.bf16.msra.mxu1 %v2133_v57  ;;  %1711 = vmatpush.bf16.msra.mxu2 %v2142_v21 }
 0x16a   : > { %1507 = vmatpush.bf16.msra.mxu0 %v2124_v53 }
 0x16b   : > { %1598 = vmatpush.bf16.msra.mxu1 %v2132_v58  ;;  %1712 = vmatpush.bf16.msra.mxu2 %v2141_v22 }
 0x16e   : > { %1508 = vmatpush.bf16.msra.mxu0 %v2123_v54 }
 0x16f   : > { %1599 = vmatpush.bf16.msra.mxu1 %v2131_v59  ;;  %1713 = vmatpush.bf16.msra.mxu2 %v2140_v23 }
 0x171   : > { %1509 = vmatmul.bf16.vlgmr.msra.gmra.mxu0 %v1432_v17 }
 0x173   : > { %1714 = vmatpush.bf16.msra.mxu2 %v2139_v31 }
 0x1ee   : > { %v1510_v61 = vpop.f32.mrf.mxu0 }
 0x1ef   : > { %v1511_v63 = vadd.f32 %v2267_v60, %v1510_v61 }
 0x1f1   : > { %v1515_v0 = vmul.f32 0.044715, %v1511_v63  ;;  %v1514_v9 = vmul.f32 0.5, %v1511_v63 }
 0x1f3   : > { %v1516_v2 = vmul.f32 %v1515_v0, %v1511_v63 }
 0x1f5   : > { %v1517_v3 = vmul.f32 %v1516_v2, %v1511_v63 }
 0x1f6   : > { %v1512_v4 = vpop.f32.mrf.mxu0 }
 0x1f7   : > { %v1518_v5 = vadd.f32 %v1517_v3, %v1511_v63 }
 0x1f9   : > { %v1519_v6 = vmul.f32 0.7978846, %v1518_v5 }
 0x1fb   : > { %2272 = vtanh.f32 %v1519_v6 }
 0x201   : > { %v2273_v8 = vpop.eup %2272 }
 0x202   : > { %v1521_v10 = vadd.f32 1.0, %v2273_v8 }
 0x204   : > { %v1522_v11 = vmul.f32 %v1521_v10, %v1514_v9 }
 0x206   : > { %v1523_v13 = vpack.c.bf16 %v1522_v11, %v1522_v11 }
 0x208   : > { %1600 = vmatmul.bf16.vlgmr.msra.gmra.mxu1 %v1523_v13 }
 0x285   : > { %v1601_v14 = vpop.f32.mrf.mxu1 }
 0x286   : > { %v1602_v16 = vadd.f32 %v2268_v7, %v1601_v14 }
 0x288   : > { %v1605_v32 = vadd.f32 %v1602_v16, %v1511_v63 }
 0x28a   : > { %1606 = vadd.xlane.f32.xlu0 %v1605_v32  ;;  %v1609_v1 = vmul.f32 %v1605_v32, %v1605_v32 }
 0x28d   : > { %v1603_v49 = vpop.f32.mrf.mxu1 }
 0x292   : > { %1610 = vadd.xlane.f32.xlu0 %v1609_v1 }
 0x2fd   : > { %v1607_v24 = vpop.xlane.xlu0 %1606 }
 0x2fe   : > { %v1608_v35 = vmul.f32 0.015625, %v1607_v24 }
 0x300   : > { %v1613_v28 = vmul.f32 %v1608_v35, %v1608_v35  ;;  %v1615_v40 = vsub.f32 %v1605_v32, %v1608_v35 }
 0x305   : > { %v1611_v25 = vpop.xlane.xlu0 %1610 }
 0x306   : > { %v1612_v29 = vmul.f32 0.015625, %v1611_v25 }
 0x308   : > { %v1614_v34 = vsub.f32 %v1612_v29, %v1613_v28 }
 0x30a   : > { %v1616_v26 = vadd.f32 1e-05, %v1614_v34 }
 0x30c   : > { %2274 = vrsqrt.f32 %v1616_v26  ;;  %vm1623_vm14 = vweird.f32 %v1616_v26 }
 0x312   : > { %v2275_v62 = vpop.eup %2274 }
 0x313   : > { %v1618_v33 = vmul.f32 %v2275_v62, %v1616_v26  ;;  %vm1624_vm13 = vweird.f32 %v2275_v62 }
 0x314   : > { %vm1625_vm15 = vmor %vm1623_vm14, %vm1624_vm13 }
 0x315   : > { %v1619_v36 = vmul.f32 %v2275_v62, %v1618_v33 }
 0x317   : > { %v1620_v37 = vmul.f32 0.5, %v1619_v36 }
 0x319   : > { %v1621_v38 = vsub.f32 1.5, %v1620_v37 }
 0x31b   : > { %v1622_v39 = vmul.f32 %v2275_v62, %v1621_v38 }
 0x31d   : > { %v1626_v42 = vsel %vm1625_vm15, %v2275_v62, %v1622_v39 }
 0x31e   : > { %v1627_v43 = vmul.f32 %v1626_v42, %v1615_v40 }
 0x320   : > { %v1632_v44 = vmul.f32 %v2269_v41, %v1627_v43 }
 0x322   : > { %v1637_v45 = vadd.f32 %v2270_v12, %v1632_v44 }
 0x324   : > { %v1638_v46 = vpack.c.bf16 %v1637_v45, %v1637_v45 }
 0x326   : > { %1715 = vmatmul.bf16.vlgmr.msra.gmra.mxu2 %v1638_v46 }
 0x3a9   : > { %v1716_v48 = vpop.f32.mrf.mxu2 }
 0x3aa   : > { %v1717_v50 = vadd.f32 %v2271_v47, %v1716_v48 }
 0x3ac   : > { %1720 = vst [vmem:[%s687_s17] sm:$0xff] %v1717_v50 }
 0x3b1   : > { %v1718_v51 = vpop.f32.mrf.mxu2 }
 0x3b2 PF: > { %s2094_s23 = sshll.u32 %s2374_s19, 3  ;;  %s3022_s24 = sld [smem:[#allocation23_spill]] }
 0x3b3   : > { %s1734_s10 = sshll.u32 %s687_s17, 4  ;;  %s3023_s18 = sand.u32 1, %s2354_s30   ;;  %s1735_s10 = int_to_ptr.vmem [resolvable:$true] %s1734_s10 }
 0x3b4   : > { %s1722_s12 = scalar_lea.sflag [#allocation6], %s3023_s18 }
 0x3b8   : > { %s1732_s3 = scalar_lea.hbm %s3022_s24, %s2094_s23  ;;  %s2296_s13 = scalar_lea.hbm %s3022_s24, 16 }
 0x3b9   : > { %s1736_s20 = sshll.u32 %s1732_s3, 4  ;;  %s1737_s20 = int_to_ptr.hbm [resolvable:$true] %s1736_s20 }
 0x3ba   : > { %s2290_s25 = sshra.s32 %s1737_s20, 4  ;;  %s2291_s25 = int_to_ptr.hbm [resolvable:$true] %s2290_s25 }
 0x3bb   : > { %s2292_s28 = scalar_lea.hbm %s2291_s25, 8  ;;  %p2297_p11 = scmp.lt.s32.totalorder %s2291_s25, %s3022_s24 }
 0x3bc   : > { %p2293_p8 = scmp.ne.s32.totalorder %s2291_s25, %s2292_s28  ;;  %p2298_p13 = scmp.lt.s32.totalorder %s2296_s13, %s2292_s28 }
 0x3be   : > { %p2294_p9 = pnand %p2293_p8, %p2537_p7  ;;  %p2299_p0 = por %p2298_p13, %p2297_p11 }
 0x3c0   : > { %p2295_p10 = pneg %p2294_p9 }
 0x3c2   : > { %p2300_p1 = pnand %p2299_p0, %p2295_p10 }
 0x3c4   : > { %2303 = shalt.err (!%p2300_p1)
}
 0x3c5   : > { %2174 = dma.vmem_to_hbm [thread:$0]  (%p2537_p7), %s1735_s10, 128, %s1737_s20, %s1722_s12  }
 0x3c6 PF: > { %s3024_s17 = sld [smem:[#allocation8_spill]]  ;;  %p2180_p2 = scmp.ge.s32.totalorder %s2386_s22, 2 }
 0x3c8   : > { %p2177_p3 = pnand %p2180_p2, %p2545_p12 }
 0x3ca   : > { %p2178_p4 = pneg %p2177_p3 }
 0x3cc   : > { %s1748_s23 = sand.u32 1, %s3024_s17  }
 0x3cd   : > { %s1749_s16 = scalar_lea.sflag [#allocation6], %s1748_s23 }
 0x3ce   : > { %2345 = dma.done.wait (%p2178_p4), %s1749_s16, 128  }
 0x3cf   : > { %2347 = vsyncadd (%p2178_p4), %s1749_s16, 4294967168  ;;  %s27_s22 = sadd.s32 1, %s2386_s22   ;;  %s3026_s16 = sld [smem:[#allocation9_spill]] }
 0x3d0   : > { %p24_p5 = scmp.ge.s32.totalorder %s27_s22, 6   ;;  %s3027_s17 = sld [smem:[#allocation15_spill]] }
 0x3d1   : > { %s3028_s18 = sld [smem:[#allocation10_spill]]  ;;  %s3032_s29 = smov %s2354_s30 }
 0x3d2   : > { %s3029_s19 = sld [smem:[#allocation11_spill]]  ;;  %s3033_s30 = smov %s2358_s15 }
 0x3d3   : > { %s3030_s20 = sld [smem:[#allocation12_spill]]  ;;  %s3034_s15 = smov %s2550_s9 }
 0x3d4   : > { %s3031_s21 = sld [smem:[#allocation13_spill]]  ;;  %26 = sbr.rel (!%p24_p5) target bundleno = 15 (0xf), region = 217 }
 0x3d9   :  { %1755 = vsyncpa [#allocation6], 1 }
 0x3da   :  { %1757 = vsyncpa [#allocation6 + $0x1], 1 }

</bundles_post_ra>
